<compile_context>
chip_gen: v7x
topology: tpu7x:2x2x1
jax: 0.10.0
libtpu: 0.0.40
codegen_flags: <defaults>
</compile_context>

<pallas_src>
import numpy as np
import jax
import jax.numpy as jnp
from jax import lax
from jax.experimental import pallas as pl
from jax.experimental.pallas import tpu as pltpu


def _column_bilstm_kernel(xg_f_ref, xg_b_ref,        # (T*C, D)  gathered/padded embeddings
                          wih_f_ref, wih_b_ref,      # (D, 4H)   gate-permuted [i,f,o,g]
                          whh_f_ref, whh_b_ref,      # (H, 4H)   gate-permuted [i,f,o,g]
                          b_f_ref, b_b_ref,          # (1, 4H)   fused b_ih + b_hh, permuted
                          len_ref,                   # (C, 1)    int32 column lengths (0 = pad)
                          out_ref,                   # (C, 2H)   [fwd final h | bwd final h]
                          xpf_ref, xpb_ref):         # VMEM scratch (T*C, 4H) each
    C = len_ref.shape[0]
    H = whh_f_ref.shape[0]
    T = xg_f_ref.shape[0] // C

    # --- prologue: hoisted input projections (one well-shaped MXU matmul per direction) ---
    xpf_ref[...] = (jnp.dot(xg_f_ref[...], wih_f_ref[...],
                            preferred_element_type=jnp.float32) + b_f_ref[...])
    xpb_ref[...] = (jnp.dot(xg_b_ref[...], wih_b_ref[...],
                            preferred_element_type=jnp.float32) + b_b_ref[...])

    lengths = len_ref[...]                            # (C, 1) int32

    def cell(gates, h, c):
        # gates columns are [i, f, o, g]: one contiguous sigmoid, one tanh
        sig = jax.nn.sigmoid(gates[:, 0:3 * H])
        i = sig[:, 0:H]
        f = sig[:, H:2 * H]
        o = sig[:, 2 * H:3 * H]
        g = jnp.tanh(gates[:, 3 * H:4 * H])
        c_new = f * c + i * g
        h_new = o * jnp.tanh(c_new)
        return h_new, c_new

    def step(t, carry):
        h_f, c_f, h_b, c_b = carry
        row = pl.multiple_of(t * C, C)
        xf = xpf_ref[pl.ds(row, C), :]                # (C, 4H) precomputed x-projection
        xb = xpb_ref[pl.ds(row, C), :]

        gates_f = xf + jnp.dot(h_f, whh_f_ref[...], preferred_element_type=jnp.float32)
        gates_b = xb + jnp.dot(h_b, whh_b_ref[...], preferred_element_type=jnp.float32)

        hf_new, cf_new = cell(gates_f, h_f, c_f)
        hb_new, cb_new = cell(gates_b, h_b, c_b)

        active = t < lengths                          # (C, 1) bool, broadcasts over H
        h_f = jnp.where(active, hf_new, h_f)
        c_f = jnp.where(active, cf_new, c_f)
        h_b = jnp.where(active, hb_new, h_b)
        c_b = jnp.where(active, cb_new, c_b)
        return h_f, c_f, h_b, c_b

    zeros = jnp.zeros((C, H), jnp.float32)
    h_f, _, h_b, _ = lax.fori_loop(0, T, step, (zeros, zeros, zeros, zeros))

    # single lane-dense store of the full (C, 2H) result
    out_ref[...] = jnp.concatenate([h_f, h_b], axis=-1)


def column_encoding_forward(seq_s, split_idx, emb_table, params):
    """Pallas implementation of ColumnEncoding.forward.

    seq_s: (S,) int32 token ids. Returns (num_cols, 2H) float32 encodings.
    Weights are stored pre-transposed: W_ih (D, 4H), W_hh (H, 4H), fused bias (1, 4H),
    PyTorch gate order [i, f, g, o].
    """
    # Split positions are computed on host, exactly like the PyTorch
    # .detach().cpu().numpy() path (data-dependent number of columns).
    seq_np = np.asarray(seq_s)
    S = int(seq_np.shape[0])
    H = params["whh_f"].shape[0]

    ends = np.nonzero(seq_np == split_idx)[0].ravel().astype(np.int64)
    if ends.size == 0:                                 # guard: no SPLIT token at all
        return jnp.zeros((0, 2 * H), jnp.float32)
    begins = np.roll(ends, 1)
    begins[0] = 0
    lengths = (ends - begins).astype(np.int32)
    num_cols = int(ends.shape[0])

    D = int(np.asarray(emb_table).shape[1])
    C = max(8, int(np.ceil(num_cols / 8.0)) * 8)       # pad columns to a sublane multiple
    T = max(1, int(lengths.max()))                     # recurrence length = longest column

    len_pad = np.zeros((C, 1), np.int32)
    len_pad[:num_cols, 0] = lengths

    # gather indices: padded-batch row (t, c) reads token fwd_idx[t, c] / bwd_idx[t, c]
    b_pad = np.zeros((C,), np.int64); b_pad[:num_cols] = begins
    e_pad = np.ones((C,), np.int64);  e_pad[:num_cols] = ends
    t_ar = np.arange(T, dtype=np.int64)[:, None]                         # (T, 1)
    fwd_idx = np.clip(b_pad[None, :] + t_ar, 0, S - 1).astype(np.int32)  # (T, C)
    bwd_idx = np.clip(e_pad[None, :] - 1 - t_ar, 0, S - 1).astype(np.int32)

    # embedding lookup + padded row gathers are glue gathers in plain JAX
    seq_se = jnp.asarray(emb_table).astype(jnp.float32)[jnp.asarray(seq_np.astype(np.int32))]
    xg_f = jnp.take(seq_se, jnp.asarray(fwd_idx.reshape(-1)), axis=0)    # (T*C, D)
    xg_b = jnp.take(seq_se, jnp.asarray(bwd_idx.reshape(-1)), axis=0)    # (T*C, D)

    # permute gate columns [i, f, g, o] -> [i, f, o, g] so the kernel applies one
    # contiguous sigmoid slice and one tanh slice
    perm = np.concatenate([np.arange(0, 2 * H), np.arange(3 * H, 4 * H),
                           np.arange(2 * H, 3 * H)])
    def pg(w):
        return jnp.asarray(w, jnp.float32)[..., perm]

    # TODO(synk): matmul operands could be cast to bf16 for native MXU rate once the
    # 1e-4 tolerance budget is re-validated; kept fp32 here for bit-faithfulness.
    vmem = pl.BlockSpec(memory_space=pltpu.MemorySpace.VMEM)
    out = pl.pallas_call(
        _column_bilstm_kernel,
        out_shape=jax.ShapeDtypeStruct((C, 2 * H), jnp.float32),
        in_specs=[vmem] * 9,
        out_specs=vmem,
        scratch_shapes=[pltpu.VMEM((T * C, 4 * H), jnp.float32),
                        pltpu.VMEM((T * C, 4 * H), jnp.float32)],
    )(xg_f, xg_b,
      pg(params["wih_f"]), pg(params["wih_b"]),
      pg(params["whh_f"]), pg(params["whh_b"]),
      pg(params["b_f"]), pg(params["b_b"]),
      jnp.asarray(len_pad))

    return out[:num_cols]


# ---------------- pure numpy reference (for correctness check) ----------------

def _ref_lstm_dir(xs, wih, whh, b):
    H = whh.shape[0]
    h = np.zeros((H,), np.float64)
    c = np.zeros((H,), np.float64)
    for x in xs:
        gates = x @ wih + h @ whh + b
        i = 1.0 / (1.0 + np.exp(-gates[0:H]))
        f = 1.0 / (1.0 + np.exp(-gates[H:2 * H]))
        g = np.tanh(gates[2 * H:3 * H])
        o = 1.0 / (1.0 + np.exp(-gates[3 * H:4 * H]))
        c = f * c + i * g
        h = o * np.tanh(c)
    return h


def column_encoding_reference(seq_s, split_idx, emb_table, params):
    seq_np = np.asarray(seq_s)
    emb = np.asarray(emb_table, np.float64)
    ends = np.nonzero(seq_np == split_idx)[0].ravel()
    begins = np.roll(ends, 1)
    begins[0] = 0
    seq_se = emb[seq_np]
    outs = []
    for b, e in zip(begins, ends):
        seg = seq_se[b:e]
        hf = _ref_lstm_dir(seg, np.asarray(params["wih_f"], np.float64),
                           np.asarray(params["whh_f"], np.float64),
                           np.asarray(params["b_f"], np.float64)[0])
        hb = _ref_lstm_dir(seg[::-1], np.asarray(params["wih_b"], np.float64),
                           np.asarray(params["whh_b"], np.float64),
                           np.asarray(params["b_b"], np.float64)[0])
        outs.append(np.concatenate([hf, hb]))
    return np.stack(outs).astype(np.float32)


if __name__ == "__main__":
    # Small, deterministic synthetic setup.
    V, D, H = 50, 64, 128       # vocab size, embedding_dim, sequence_size // 2
    S = 18                      # header token sequence length
    SPLIT_IDX = 0               # index of wikisql.SPLIT_WORD in the vocab

    key = jax.random.PRNGKey(0)
    (k_emb, k1, k2, k3, k4, k5, k6, k7, k8, k_tok) = jax.random.split(key, 10)
    scale = 0.1
    emb_table = jax.random.normal(k_emb, (V, D), jnp.float32) * scale
    params = {
        # forward direction
        "wih_f": jax.random.normal(k1, (D, 4 * H), jnp.float32) * scale,
        "whh_f": jax.random.normal(k2, (H, 4 * H), jnp.float32) * scale,
        "b_f": (jax.random.normal(k3, (1, 4 * H), jnp.float32) * scale
                + jax.random.normal(k4, (1, 4 * H), jnp.float32) * scale),  # b_ih + b_hh
        # backward direction
        "wih_b": jax.random.normal(k5, (D, 4 * H), jnp.float32) * scale,
        "whh_b": jax.random.normal(k6, (H, 4 * H), jnp.float32) * scale,
        "b_b": (jax.random.normal(k7, (1, 4 * H), jnp.float32) * scale
                + jax.random.normal(k8, (1, 4 * H), jnp.float32) * scale),
    }

    # Header token ids with SPLIT_WORD markers delimiting 3 columns.
    # (np.array(...) makes a writable copy; np.asarray of a jax array is read-only.)
    seq_np = np.array(jax.random.randint(k_tok, (S,), 1, V), dtype=np.int32)
    seq_np[[5, 11, 17]] = SPLIT_IDX
    seq_s = jnp.asarray(seq_np)

    out = column_encoding_forward(seq_s, SPLIT_IDX, emb_table, params)
    out = jax.block_until_ready(out)

    ref = column_encoding_reference(seq_np, SPLIT_IDX, emb_table, params)
    np.testing.assert_allclose(np.asarray(out), ref, rtol=1e-4, atol=1e-4)
    print("KERNEL_OK")
</pallas_src>

<mosaic_0001>
module attributes {stable_mosaic.version = 11 : i64} {
  func.func @_column_bilstm_kernel(%arg0: memref<48x64xf32, #tpu.memory_space<vmem>>, %arg1: memref<48x64xf32, #tpu.memory_space<vmem>>, %arg2: memref<64x512xf32, #tpu.memory_space<vmem>>, %arg3: memref<64x512xf32, #tpu.memory_space<vmem>>, %arg4: memref<128x512xf32, #tpu.memory_space<vmem>>, %arg5: memref<128x512xf32, #tpu.memory_space<vmem>>, %arg6: memref<1x512xf32, #tpu.memory_space<vmem>>, %arg7: memref<1x512xf32, #tpu.memory_space<vmem>>, %arg8: memref<8x1xi32, #tpu.memory_space<vmem>>, %arg9: memref<8x256xf32, #tpu.memory_space<vmem>>, %arg10: memref<48x512xf32, #tpu.memory_space<vmem>>, %arg11: memref<48x512xf32, #tpu.memory_space<vmem>>) attributes {dimension_semantics = [], scalar_prefetch = 0 : i64, scratch_operands = 2 : i64, tpu.core_type = #tpu.core_type<tc>} {
    %c0 = arith.constant 0 : index
    %c0_0 = arith.constant 0 : index
    %0 = vector.load %arg0[%c0, %c0_0] : memref<48x64xf32, #tpu.memory_space<vmem>>, vector<48x64xf32>
    %c0_1 = arith.constant 0 : index
    %c0_2 = arith.constant 0 : index
    %1 = vector.load %arg2[%c0_1, %c0_2] : memref<64x512xf32, #tpu.memory_space<vmem>>, vector<64x512xf32>
    %cst = arith.constant dense<0.000000e+00> : vector<48x512xf32>
    %2 = tpu.matmul %0, %1, %cst {dimension_numbers = #tpu.dot_dimension_numbers<[1], [0], [0], [1], [0, 0, 1, 1], [], []>} : vector<48x64xf32>, vector<64x512xf32>, vector<48x512xf32> -> vector<48x512xf32>
    %c0_3 = arith.constant 0 : index
    %c0_4 = arith.constant 0 : index
    %3 = vector.load %arg6[%c0_3, %c0_4] : memref<1x512xf32, #tpu.memory_space<vmem>>, vector<1x512xf32>
    %4 = vector.broadcast %3 : vector<1x512xf32> to vector<48x512xf32>
    %5 = arith.addf %2, %4 : vector<48x512xf32>
    %c0_5 = arith.constant 0 : index
    %c0_6 = arith.constant 0 : index
    %6 = vector.load %arg10[%c0_5, %c0_6] : memref<48x512xf32, #tpu.memory_space<vmem>>, vector<48x512xf32>
    tpu.vector_store %arg10[%c0_5, %c0_6], %5 {strides = array<i32>} : memref<48x512xf32, #tpu.memory_space<vmem>>, vector<48x512xf32>,
    %c0_7 = arith.constant 0 : index
    %c0_8 = arith.constant 0 : index
    %7 = vector.load %arg1[%c0_7, %c0_8] : memref<48x64xf32, #tpu.memory_space<vmem>>, vector<48x64xf32>
    %c0_9 = arith.constant 0 : index
    %c0_10 = arith.constant 0 : index
    %8 = vector.load %arg3[%c0_9, %c0_10] : memref<64x512xf32, #tpu.memory_space<vmem>>, vector<64x512xf32>
    %cst_11 = arith.constant dense<0.000000e+00> : vector<48x512xf32>
    %9 = tpu.matmul %7, %8, %cst_11 {dimension_numbers = #tpu.dot_dimension_numbers<[1], [0], [0], [1], [0, 0, 1, 1], [], []>} : vector<48x64xf32>, vector<64x512xf32>, vector<48x512xf32> -> vector<48x512xf32>
    %c0_12 = arith.constant 0 : index
    %c0_13 = arith.constant 0 : index
    %10 = vector.load %arg7[%c0_12, %c0_13] : memref<1x512xf32, #tpu.memory_space<vmem>>, vector<1x512xf32>
    %11 = vector.broadcast %10 : vector<1x512xf32> to vector<48x512xf32>
    %12 = arith.addf %9, %11 : vector<48x512xf32>
    %c0_14 = arith.constant 0 : index
    %c0_15 = arith.constant 0 : index
    %13 = vector.load %arg11[%c0_14, %c0_15] : memref<48x512xf32, #tpu.memory_space<vmem>>, vector<48x512xf32>
    tpu.vector_store %arg11[%c0_14, %c0_15], %12 {strides = array<i32>} : memref<48x512xf32, #tpu.memory_space<vmem>>, vector<48x512xf32>,
    %c0_16 = arith.constant 0 : index
    %c0_17 = arith.constant 0 : index
    %14 = vector.load %arg8[%c0_16, %c0_17] : memref<8x1xi32, #tpu.memory_space<vmem>>, vector<8x1xi32>
    %cst_18 = arith.constant 0.000000e+00 : f32
    %15 = vector.broadcast %cst_18 : f32 to vector<8x128xf32>
    %c0_i32 = arith.constant 0 : i32
    %c6_i32 = arith.constant 6 : i32
    %16 = arith.addi %c0_i32, %c6_i32 : i32
    %c1_i32 = arith.constant 1 : i32
    %17:4 = scf.for %arg12 = %c0_i32 to %16 step %c1_i32 iter_args(%arg13 = %15, %arg14 = %15, %arg15 = %15, %arg16 = %15) -> (vector<8x128xf32>, vector<8x128xf32>, vector<8x128xf32>, vector<8x128xf32>)  : i32 {
      %c8_i32 = arith.constant 8 : i32
      %20 = arith.muli %arg12, %c8_i32 : i32
      %21 = tpu.assume_multiple %20, 8 : i32
      %22 = arith.index_cast %21 : i32 to index
      %c0_22 = arith.constant 0 : index
      %23 = vector.load %arg10[%22, %c0_22] : memref<48x512xf32, #tpu.memory_space<vmem>>, vector<8x512xf32>
      %24 = arith.index_cast %21 : i32 to index
      %c0_23 = arith.constant 0 : index
      %25 = vector.load %arg11[%24, %c0_23] : memref<48x512xf32, #tpu.memory_space<vmem>>, vector<8x512xf32>
      %c0_24 = arith.constant 0 : index
      %c0_25 = arith.constant 0 : index
      %26 = vector.load %arg4[%c0_24, %c0_25] : memref<128x512xf32, #tpu.memory_space<vmem>>, vector<128x512xf32>
      %cst_26 = arith.constant dense<0.000000e+00> : vector<8x512xf32>
      %27 = tpu.matmul %arg13, %26, %cst_26 {dimension_numbers = #tpu.dot_dimension_numbers<[1], [0], [0], [1], [0, 0, 1, 1], [], []>} : vector<8x128xf32>, vector<128x512xf32>, vector<8x512xf32> -> vector<8x512xf32>
      %28 = arith.addf %23, %27 : vector<8x512xf32>
      %c0_27 = arith.constant 0 : index
      %c0_28 = arith.constant 0 : index
      %29 = vector.load %arg5[%c0_27, %c0_28] : memref<128x512xf32, #tpu.memory_space<vmem>>, vector<128x512xf32>
      %cst_29 = arith.constant dense<0.000000e+00> : vector<8x512xf32>
      %30 = tpu.matmul %arg15, %29, %cst_29 {dimension_numbers = #tpu.dot_dimension_numbers<[1], [0], [0], [1], [0, 0, 1, 1], [], []>} : vector<8x128xf32>, vector<128x512xf32>, vector<8x512xf32> -> vector<8x512xf32>
      %31 = arith.addf %25, %30 : vector<8x512xf32>
      %32 = vector.extract_strided_slice %28 {offsets = [0, 0], sizes = [8, 384], strides = [1, 1]} : vector<8x512xf32> to vector<8x384xf32>
      %33 = arith.negf %32 : vector<8x384xf32>
      %34 = math.exp %33 : vector<8x384xf32>
      %cst_30 = arith.constant 1.000000e+00 : f32
      %35 = vector.broadcast %cst_30 : f32 to vector<8x384xf32>
      %36 = arith.addf %35, %34 : vector<8x384xf32>
      %37 = arith.divf %35, %36 : vector<8x384xf32>
      %38 = vector.extract_strided_slice %37 {offsets = [0, 0], sizes = [8, 128], strides = [1, 1]} : vector<8x384xf32> to vector<8x128xf32>
      %39 = vector.extract_strided_slice %37 {offsets = [0, 128], sizes = [8, 128], strides = [1, 1]} : vector<8x384xf32> to vector<8x128xf32>
      %40 = vector.extract_strided_slice %37 {offsets = [0, 256], sizes = [8, 128], strides = [1, 1]} : vector<8x384xf32> to vector<8x128xf32>
      %41 = vector.extract_strided_slice %28 {offsets = [0, 384], sizes = [8, 128], strides = [1, 1]} : vector<8x512xf32> to vector<8x128xf32>
      %42 = math.tanh %41 : vector<8x128xf32>
      %43 = arith.mulf %39, %arg14 : vector<8x128xf32>
      %44 = arith.mulf %38, %42 : vector<8x128xf32>
      %45 = arith.addf %43, %44 : vector<8x128xf32>
      %46 = math.tanh %45 : vector<8x128xf32>
      %47 = arith.mulf %40, %46 : vector<8x128xf32>
      %48 = vector.extract_strided_slice %31 {offsets = [0, 0], sizes = [8, 384], strides = [1, 1]} : vector<8x512xf32> to vector<8x384xf32>
      %49 = arith.negf %48 : vector<8x384xf32>
      %50 = math.exp %49 : vector<8x384xf32>
      %cst_31 = arith.constant 1.000000e+00 : f32
      %51 = vector.broadcast %cst_31 : f32 to vector<8x384xf32>
      %52 = arith.addf %51, %50 : vector<8x384xf32>
      %53 = arith.divf %51, %52 : vector<8x384xf32>
      %54 = vector.extract_strided_slice %53 {offsets = [0, 0], sizes = [8, 128], strides = [1, 1]} : vector<8x384xf32> to vector<8x128xf32>
      %55 = vector.extract_strided_slice %53 {offsets = [0, 128], sizes = [8, 128], strides = [1, 1]} : vector<8x384xf32> to vector<8x128xf32>
      %56 = vector.extract_strided_slice %53 {offsets = [0, 256], sizes = [8, 128], strides = [1, 1]} : vector<8x384xf32> to vector<8x128xf32>
      %57 = vector.extract_strided_slice %31 {offsets = [0, 384], sizes = [8, 128], strides = [1, 1]} : vector<8x512xf32> to vector<8x128xf32>
      %58 = math.tanh %57 : vector<8x128xf32>
      %59 = arith.mulf %55, %arg16 : vector<8x128xf32>
      %60 = arith.mulf %54, %58 : vector<8x128xf32>
      %61 = arith.addf %59, %60 : vector<8x128xf32>
      %62 = math.tanh %61 : vector<8x128xf32>
      %63 = arith.mulf %56, %62 : vector<8x128xf32>
      %64 = vector.broadcast %arg12 : i32 to vector<8x1xi32>
      %65 = arith.cmpi slt, %64, %14 : vector<8x1xi32>
      %66 = vector.shape_cast %65 : vector<8x1xi1> to vector<8x1xi1>
      %67 = vector.broadcast %66 : vector<8x1xi1> to vector<8x128xi1>
      %68 = arith.select %67, %47, %arg13 : vector<8x128xi1>, vector<8x128xf32>
      %69 = vector.shape_cast %65 : vector<8x1xi1> to vector<8x1xi1>
      %70 = vector.broadcast %69 : vector<8x1xi1> to vector<8x128xi1>
      %71 = arith.select %70, %45, %arg14 : vector<8x128xi1>, vector<8x128xf32>
      %72 = vector.shape_cast %65 : vector<8x1xi1> to vector<8x1xi1>
      %73 = vector.broadcast %72 : vector<8x1xi1> to vector<8x128xi1>
      %74 = arith.select %73, %63, %arg15 : vector<8x128xi1>, vector<8x128xf32>
      %75 = vector.shape_cast %65 : vector<8x1xi1> to vector<8x1xi1>
      %76 = vector.broadcast %75 : vector<8x1xi1> to vector<8x128xi1>
      %77 = arith.select %76, %61, %arg16 : vector<8x128xi1>, vector<8x128xf32>
      scf.yield %68, %71, %74, %77 : vector<8x128xf32>, vector<8x128xf32>, vector<8x128xf32>, vector<8x128xf32>
    }
    %c6_i32_19 = arith.constant 6 : i32
    %18 = tpu.concatenate %17#0, %17#2 in 1 : vector<8x128xf32>, vector<8x128xf32> -> vector<8x256xf32>
    %c0_20 = arith.constant 0 : index
    %c0_21 = arith.constant 0 : index
    %19 = vector.load %arg9[%c0_20, %c0_21] : memref<8x256xf32, #tpu.memory_space<vmem>>, vector<8x256xf32>
    tpu.vector_store %arg9[%c0_20, %c0_21], %18 {strides = array<i32>} : memref<8x256xf32, #tpu.memory_space<vmem>>, vector<8x256xf32>,
    return
  }
}

</mosaic_0001>

<bundles_post_ra>
// kernel: tpu_custom_call.1
= control target key start
LH: loop header
LB: loop body
LE: loop exit
PB: predicated region body
PF: predicated region fallthrough
CT: control target
= control target key end

     0   :  { %14 = vsyncpa [#allocation5], 0  ;;  %s2165_s0 = inlined_call_operand.hbm [shape: f32[48,64], index: 0, kind: input, shape index: {}]   ;;  %s2166_s1 = inlined_call_operand.hbm [shape: f32[48,64], index: 1, kind: input, shape index: {}]   ;;  %s2167_s2 = inlined_call_operand.hbm [shape: f32[64,512], index: 2, kind: input, shape index: {}]   ;;  %s2168_s3 = inlined_call_operand.hbm [shape: f32[64,512], index: 3, kind: input, shape index: {}]   ;;  %s2169_s4 = inlined_call_operand.hbm [shape: f32[128,512], index: 4, kind: input, shape index: {}]   ;;  %s2170_s5 = inlined_call_operand.hbm [shape: f32[128,512], index: 5, kind: input, shape index: {}]   ;;  %s2171_s6 = inlined_call_operand.vmem [shape: f32[1,512], index: 6, kind: input, shape index: {}]   ;;  %s2172_s7 = inlined_call_operand.vmem [shape: f32[1,512], index: 7, kind: input, shape index: {}]   ;;  %s2173_s8 = inlined_call_operand.vmem [shape: s32[8,1], index: 8, kind: input, shape index: {}]   ;;  %s2174_s9 = inlined_call_operand.hbm [shape: f32[8,256], index: 9, kind: output, shape index: {}]  }
   0x1   :  { %15 = vsyncpa [#allocation8], 0 }
   0x2   :  { %16 = vsyncpa [#allocation11], 0 }
   0x3   :  { %17 = vsyncpa [#allocation14], 0 }
   0x4   :  { %18 = vsyncpa [#allocation6], 0  ;;  %s1790_s30 = smov [#allocation7]   ;;  %s1586_s13 = scalar_lea.hbm %s2166_s1, 768 }
   0x5   :  { %s36_s10 = sshll.u32 %s1790_s30, 4  ;;  %p1587_p0 = scmp.ne.s32.totalorder %s2166_s1, %s1586_s13  ;;  %s37_s10 = int_to_ptr.vmem [resolvable:$true] %s36_s10 }
   0x6   :  { %p1590_p1 = scmp.lt.u32.totalorder %s1586_s13, %s2166_s1 }
   0x8   :  { %p1592_p2 = pnand %p1590_p1, %p1587_p0 }
   0xa   :  { %1595 = shalt.err (!%p1592_p2)
}
   0xb   :  { %s1596_s18 = scalar_lea.vmem %s37_s10, 768  ;;  %p1601_p4 = scmp.lt.s32.totalorder %s37_s10, %s37_s10 }
   0xc   :  { %p1597_p3 = scmp.ne.s32.totalorder %s37_s10, %s1596_s18  ;;  %p1602_p5 = scmp.lt.s32.totalorder %s1596_s18, %s1596_s18 }
   0xe   :  { %p1603_p6 = por %p1602_p5, %p1601_p4 }
  0x10   :  { %p1604_p7 = pnand %p1603_p6, %p1597_p3 }
  0x12   :  { %1607 = shalt.err (!%p1604_p7)
}
  0x13   :  { %s1791_s19 = smov 128   ;;  %s1792_s20 = smov 8  }
  0x14   :  { %42 = dma.hbm_to_vmem [thread:$0]  %s2166_s1, 768, %s37_s10, [#allocation8], %s1791_s19, %s1791_s19, %s1792_s20  }
  0x15   :  { %s1793_s23 = smov [#allocation10]   ;;  %s1794_s25 = smov [#allocation4]  }
  0x16   :  { %s60_s24 = sshll.u32 %s1793_s23, 4  ;;  %s24_s26 = sshll.u32 %s1794_s25, 4  ;;  %s61_s24 = int_to_ptr.vmem [resolvable:$true] %s60_s24  ;;  %s25_s26 = int_to_ptr.vmem [resolvable:$true] %s24_s26 }
  0x17   :  { %s1608_s29 = scalar_lea.hbm %s2168_s3, 4096 }
  0x18   :  { %p1609_p8 = scmp.ne.s32.totalorder %s2168_s3, %s1608_s29  ;;  %p1612_p9 = scmp.lt.u32.totalorder %s1608_s29, %s2168_s3 }
  0x1a   :  { %p1614_p10 = pnand %p1612_p9, %p1609_p8 }
  0x1c   :  { %1617 = shalt.err (!%p1614_p10)
}
  0x1d   :  { %s1618_s1 = scalar_lea.vmem %s61_s24, 4096  ;;  %p1623_p12 = scmp.lt.s32.totalorder %s61_s24, %s61_s24 }
  0x1e   :  { %p1619_p11 = scmp.ne.s32.totalorder %s61_s24, %s1618_s1  ;;  %p1624_p13 = scmp.lt.s32.totalorder %s1618_s1, %s1618_s1 }
  0x20   :  { %p1625_p0 = por %p1624_p13, %p1623_p12 }
  0x22   :  { %p1626_p1 = pnand %p1625_p0, %p1619_p11 }
  0x24   :  { %1629 = shalt.err (!%p1626_p1)
}
  0x25   :  { %s1795_s10 = smov 512   ;;  %s1796_s14 = smov 32  }
  0x26   :  { %66 = dma.hbm_to_vmem [thread:$0]  %s2168_s3, 4096, %s61_s24, [#allocation11], %s1795_s10, %s1795_s10, %s1796_s14  }
  0x27   :  { %s1630_s21 = scalar_lea.hbm %s2165_s0, 768 }
  0x28   :  { %p1631_p2 = scmp.ne.s32.totalorder %s2165_s0, %s1630_s21  ;;  %p1634_p3 = scmp.lt.u32.totalorder %s1630_s21, %s2165_s0 }
  0x2a   :  { %p1636_p4 = pnand %p1634_p3, %p1631_p2 }
  0x2c   :  { %1639 = shalt.err (!%p1636_p4)
}
  0x2d   :  { %s1640_s28 = scalar_lea.vmem %s25_s26, 768  ;;  %p1645_p6 = scmp.lt.s32.totalorder %s25_s26, %s25_s26 }
  0x2e   :  { %p1641_p5 = scmp.ne.s32.totalorder %s25_s26, %s1640_s28  ;;  %p1646_p7 = scmp.lt.s32.totalorder %s1640_s28, %s1640_s28 }
  0x30   :  { %p1647_p8 = por %p1646_p7, %p1645_p6 }
  0x32   :  { %p1648_p9 = pnand %p1647_p8, %p1641_p5 }
  0x34   :  { %1651 = shalt.err (!%p1648_p9)
}
  0x35   :  { %30 = dma.hbm_to_vmem [thread:$0]  %s2165_s0, 768, %s25_s26, [#allocation5], %s1791_s19, %s1791_s19, %s1792_s20  }
  0x36   :  { %s1797_s29 = smov [#allocation9]   ;;  %s1798_s11 = smov [#allocation12]  }
  0x37   :  { %s48_s30 = sshll.u32 %s1797_s29, 4  ;;  %s72_s12 = sshll.u32 %s1798_s11, 4  ;;  %s49_s30 = int_to_ptr.vmem [resolvable:$true] %s48_s30  ;;  %s73_s12 = int_to_ptr.vmem [resolvable:$true] %s72_s12 }
  0x38   :  { %s1652_s15 = scalar_lea.hbm %s2167_s2, 4096 }
  0x39   :  { %p1653_p10 = scmp.ne.s32.totalorder %s2167_s2, %s1652_s15  ;;  %p1656_p11 = scmp.lt.u32.totalorder %s1652_s15, %s2167_s2 }
  0x3b   :  { %p1658_p12 = pnand %p1656_p11, %p1653_p10 }
  0x3d   :  { %1661 = shalt.err (!%p1658_p12)
}
  0x3e   :  { %s1662_s0 = scalar_lea.vmem %s49_s30, 4096  ;;  %p1667_p0 = scmp.lt.s32.totalorder %s49_s30, %s49_s30 }
  0x3f   :  { %p1663_p13 = scmp.ne.s32.totalorder %s49_s30, %s1662_s0  ;;  %p1668_p1 = scmp.lt.s32.totalorder %s1662_s0, %s1662_s0 }
  0x41   :  { %p1669_p2 = por %p1668_p1, %p1667_p0 }
  0x43   :  { %p1670_p3 = pnand %p1669_p2, %p1663_p13 }
  0x45   :  { %1673 = shalt.err (!%p1670_p3)
}
  0x46   :  { %54 = dma.hbm_to_vmem [thread:$0]  %s2167_s2, 4096, %s49_s30, [#allocation8], %s1795_s10, %s1795_s10, %s1796_s14  }
  0x47   :  { %s1674_s23 = scalar_lea.hbm %s2169_s4, 8192 }
  0x48   :  { %p1675_p4 = scmp.ne.s32.totalorder %s2169_s4, %s1674_s23  ;;  %p1678_p5 = scmp.lt.u32.totalorder %s1674_s23, %s2169_s4 }
  0x4a   :  { %p1680_p6 = pnand %p1678_p5, %p1675_p4 }
  0x4c   :  { %1683 = shalt.err (!%p1680_p6)
}
  0x4d   :  { %s1684_s24 = scalar_lea.vmem %s73_s12, 8192  ;;  %p1689_p8 = scmp.lt.s32.totalorder %s73_s12, %s73_s12 }
  0x4e   :  { %p1685_p7 = scmp.ne.s32.totalorder %s73_s12, %s1684_s24  ;;  %p1690_p9 = scmp.lt.s32.totalorder %s1684_s24, %s1684_s24 }
  0x50   :  { %p1691_p10 = por %p1690_p9, %p1689_p8 }
  0x52   :  { %p1692_p11 = pnand %p1691_p10, %p1685_p7 }
  0x54   :  { %1695 = shalt.err (!%p1692_p11)
}
  0x55   :  { %78 = dma.hbm_to_vmem [thread:$0]  %s2169_s4, 8192, %s73_s12, [#allocation11], %s1795_s10, %s1795_s10, %s1796_s14  }
  0x56   :  { %s1799_s30 = smov [#allocation13]   ;;  %s1696_s15 = scalar_lea.hbm %s2170_s5, 8192 }
  0x57   :  { %s84_s11 = sshll.u32 %s1799_s30, 4  ;;  %p1697_p12 = scmp.ne.s32.totalorder %s2170_s5, %s1696_s15  ;;  %s85_s11 = int_to_ptr.vmem [resolvable:$true] %s84_s11 }
  0x58   :  { %p1700_p13 = scmp.lt.u32.totalorder %s1696_s15, %s2170_s5 }
  0x5a   :  { %p1702_p0 = pnand %p1700_p13, %p1697_p12 }
  0x5c   :  { %1705 = shalt.err (!%p1702_p0)
}
  0x5d   :  { %s1706_s0 = scalar_lea.vmem %s85_s11, 8192  ;;  %p1711_p2 = scmp.lt.s32.totalorder %s85_s11, %s85_s11 }
  0x5e   :  { %p1707_p1 = scmp.ne.s32.totalorder %s85_s11, %s1706_s0  ;;  %p1712_p3 = scmp.lt.s32.totalorder %s1706_s0, %s1706_s0 }
  0x60   :  { %p1713_p4 = por %p1712_p3, %p1711_p2 }
  0x62   :  { %p1714_p5 = pnand %p1713_p4, %p1707_p1 }
  0x64   :  { %1717 = shalt.err (!%p1714_p5)
}
  0x65   :  { %90 = dma.hbm_to_vmem [thread:$0]  %s2170_s5, 8192, %s85_s11, [#allocation14], %s1795_s10, %s1795_s10, %s1796_s14  }
  0x66   :  { %1760 = dma.done.wait [#allocation5], 768  }
  0x67   :  { %1761 = vsyncadd [#allocation5], 4294966528 }
  0x68   :  { %1762 = dma.done.wait [#allocation8], 4864  }
  0x69   :  { %1763 = vsyncadd [#allocation8], 4294962432 }
  0x6a   :  { %1764 = dma.done.wait [#allocation11], 12288  }
  0x6b   :  { %1765 = vsyncadd [#allocation11], 4294955008 }
  0x6c   :  { %1766 = dma.done.wait [#allocation14], 8192  }
  0x6d   :  { %1767 = vsyncadd [#allocation14], 4294959104  ;;  %v1800_v0 = vmov 0.0   ;;  %v1949_v1 = vld [vmem:[%s2173_s8] sm:$0xff]  ;;  %v122_v2 = vld [vmem:[#allocation9 + $0x8] sm:$0xff]  ;;  %vm175_vm0 = vcmask 523264  }
  0x6e   :  { %258 = vmatprep.mubr.f32.mxu0 %v1800_v0  ;;  %359 = vmatprep.mubr.f32.mxu1 %v1800_v0  ;;  %v126_v3 = vld [vmem:[#allocation9 + $0x28] sm:$0xff]  ;;  %v124_v5 = vld [vmem:[#allocation9 + $0x18] sm:$0xff]  ;;  %v121_v7 = vld [vmem:[#allocation9] sm:$0xff] }
  0x6f   :  { %v1307_v4 = vpack.c.bf16 %v126_v3, %v122_v2  ;;  %v128_v6 = vld [vmem:[#allocation9 + $0x38] sm:$0xff]  ;;  %v125_v9 = vld [vmem:[#allocation9 + $0x20] sm:$0xff]  ;;  %v123_v10 = vld [vmem:[#allocation9 + $0x10] sm:$0xff] }
  0x70   :  { %v1323_v8 = vpack.c.bf16 %v128_v6, %v124_v5  ;;  %v127_v11 = vld [vmem:[#allocation9 + $0x30] sm:$0xff]  ;;  %v1309_v12 = vpack.c.bf16 %v125_v9, %v121_v7  ;;  %v130_v14 = vld [vmem:[#allocation9 + $0x48] sm:$0xff]  ;;  %v132_v16 = vld [vmem:[#allocation9 + $0x58] sm:$0xff] }
  0x71   :  { %1308 = vmatprep.subr.bf16.mxu0 %v1307_v4  ;;  %v1325_v13 = vpack.c.bf16 %v127_v11, %v123_v10  ;;  %v134_v15 = vld [vmem:[#allocation9 + $0x68] sm:$0xff]  ;;  %v136_v18 = vld [vmem:[#allocation9 + $0x78] sm:$0xff]  ;;  %v129_v19 = vld [vmem:[#allocation9 + $0x40] sm:$0xff] }
  0x72   :  { %1324 = vmatprep.subr.bf16.mxu1 %v1323_v8  ;;  %v1311_v17 = vpack.c.bf16 %v134_v15, %v130_v14  ;;  %v133_v20 = vld [vmem:[#allocation9 + $0x60] sm:$0xff]  ;;  %1310 = vmatpush1.bf16.msra.mxu0 %v1309_v12  ;;  %v1327_v21 = vpack.c.bf16 %v136_v18, %v132_v16  ;;  %v131_v23 = vld [vmem:[#allocation9 + $0x50] sm:$0xff]  ;;  %v138_v25 = vld [vmem:[#allocation9 + $0x88] sm:$0xff] }
  0x73   :  { %1326 = vmatpush1.bf16.msra.mxu1 %v1325_v13  ;;  %v1313_v22 = vpack.c.bf16 %v133_v20, %v129_v19  ;;  %v135_v24 = vld [vmem:[#allocation9 + $0x70] sm:$0xff]  ;;  %v142_v27 = vld [vmem:[#allocation9 + $0xa8] sm:$0xff]  ;;  %v140_v28 = vld [vmem:[#allocation9 + $0x98] sm:$0xff] }
  0x74   :  { %1312 = vmatprep.subr.bf16.mxu0 %v1311_v17  ;;  %v1329_v26 = vpack.c.bf16 %v135_v24, %v131_v23  ;;  %v144_v29 = vld [vmem:[#allocation9 + $0xb8] sm:$0xff]  ;;  %1328 = vmatprep.subr.bf16.mxu1 %v1327_v21  ;;  %v1315_v30 = vpack.c.bf16 %v142_v27, %v138_v25  ;;  %v137_v32 = vld [vmem:[#allocation9 + $0x80] sm:$0xff]  ;;  %v139_v34 = vld [vmem:[#allocation9 + $0x90] sm:$0xff] }
  0x75   :  { %v1331_v31 = vpack.c.bf16 %v144_v29, %v140_v28  ;;  %v141_v33 = vld [vmem:[#allocation9 + $0xa0] sm:$0xff]  ;;  %v143_v35 = vld [vmem:[#allocation9 + $0xb0] sm:$0xff]  ;;  %v146_v36 = vld [vmem:[#allocation9 + $0xc8] sm:$0xff] }
  0x76   :  { %v150_v37 = vld [vmem:[#allocation9 + $0xe8] sm:$0xff]  ;;  %1314 = vmatpush1.bf16.msra.mxu0 %v1313_v22  ;;  %v1317_v38 = vpack.c.bf16 %v141_v33, %v137_v32  ;;  %v1333_v39 = vpack.c.bf16 %v143_v35, %v139_v34  ;;  %v148_v40 = vld [vmem:[#allocation9 + $0xd8] sm:$0xff]  ;;  %v145_v42 = vld [vmem:[#allocation9 + $0xc0] sm:$0xff] }
  0x77   :  { %1330 = vmatpush1.bf16.msra.mxu1 %v1329_v26  ;;  %v152_v41 = vld [vmem:[#allocation9 + $0xf8] sm:$0xff]  ;;  %1316 = vmatprep.subr.bf16.mxu0 %v1315_v30  ;;  %v1319_v43 = vpack.c.bf16 %v150_v37, %v146_v36  ;;  %v149_v45 = vld [vmem:[#allocation9 + $0xe0] sm:$0xff]  ;;  %v147_v46 = vld [vmem:[#allocation9 + $0xd0] sm:$0xff] }
  0x78   :  { %1332 = vmatprep.subr.bf16.mxu1 %v1331_v31  ;;  %v1335_v44 = vpack.c.bf16 %v152_v41, %v148_v40  ;;  %v151_v47 = vld [vmem:[#allocation9 + $0xf0] sm:$0xff]  ;;  %v427_v48 = vld [vmem:[#allocation10 + $0x8] sm:$0xff]  ;;  %v429_v50 = vld [vmem:[#allocation10 + $0x18] sm:$0xff]  ;;  %v1321_v52 = vpack.c.bf16 %v149_v45, %v145_v42 }
  0x79   :  { %v431_v49 = vld [vmem:[#allocation10 + $0x28] sm:$0xff]  ;;  %v433_v51 = vld [vmem:[#allocation10 + $0x38] sm:$0xff]  ;;  %v1337_v53 = vpack.c.bf16 %v151_v47, %v147_v46  ;;  %v426_v54 = vld [vmem:[#allocation10] sm:$0xff] }
  0x7a   :  { %1318 = vmatpush1.bf16.msra.mxu0 %v1317_v38  ;;  %v1339_v55 = vpack.c.bf16 %v431_v49, %v427_v48  ;;  %v1355_v56 = vpack.c.bf16 %v433_v51, %v429_v50  ;;  %v430_v57 = vld [vmem:[#allocation10 + $0x20] sm:$0xff]  ;;  %v428_v58 = vld [vmem:[#allocation10 + $0x10] sm:$0xff]  ;;  %v435_v60 = vld [vmem:[#allocation10 + $0x48] sm:$0xff]  ;;  %v155_v48 = vlaneseq }
  0x7b   :  { %1334 = vmatpush1.bf16.msra.mxu1 %v1333_v39  ;;  %1320 = vmatprep.subr.bf16.mxu0 %v1319_v43  ;;  %v432_v59 = vld [vmem:[#allocation10 + $0x30] sm:$0xff]  ;;  %v439_v61 = vld [vmem:[#allocation10 + $0x68] sm:$0xff]  ;;  %v437_v62 = vld [vmem:[#allocation10 + $0x58] sm:$0xff]  ;;  %v1341_v3 = vpack.c.bf16 %v430_v57, %v426_v54 }
  0x7c   :  { %1336 = vmatprep.subr.bf16.mxu1 %v1335_v44  ;;  %v441_v63 = vld [vmem:[#allocation10 + $0x78] sm:$0xff]  ;;  %v115_v2 = vld [vmem:[#allocation4] sm:$0xff]  ;;  %v1357_v4 = vpack.c.bf16 %v432_v59, %v428_v58  ;;  %v1343_v7 = vpack.c.bf16 %v439_v61, %v435_v60  ;;  %v436_v9 = vld [vmem:[#allocation10 + $0x50] sm:$0xff]  ;;  %v1997_v49 = vshrl.u32 %v155_v48, 7 }
  0x7d   :  { %v434_v5 = vld [vmem:[#allocation10 + $0x40] sm:$0xff]  ;;  %v1359_v8 = vpack.c.bf16 %v441_v63, %v437_v62  ;;  %v440_v10 = vld [vmem:[#allocation10 + $0x70] sm:$0xff]  ;;  %v443_v11 = vld [vmem:[#allocation10 + $0x88] sm:$0xff] }
  0x7e   :  { %1322 = vmatpush1.bf16.msra.mxu0 %v1321_v52  ;;  %v438_v6 = vld [vmem:[#allocation10 + $0x60] sm:$0xff]  ;;  %v447_v12 = vld [vmem:[#allocation10 + $0xa8] sm:$0xff]  ;;  %v445_v13 = vld [vmem:[#allocation10 + $0x98] sm:$0xff]  ;;  %v1361_v17 = vpack.c.bf16 %v440_v10, %v436_v9  ;;  %v157_v50 = vsub.s32 0, %v1997_v49  ;;  %v165_v51 = vsub.s32 2, %v1997_v49 }
  0x7f   :  { %1338 = vmatpush1.bf16.msra.mxu1 %v1337_v53  ;;  %1340 = vmatprep.subr.bf16.mxu0 %v1339_v55  ;;  %v449_v14 = vld [vmem:[#allocation10 + $0xb8] sm:$0xff]  ;;  %v116_v15 = vld [vmem:[#allocation4 + $0x8] sm:$0xff]  ;;  %v1345_v16 = vpack.c.bf16 %v438_v6, %v434_v5  ;;  %v442_v18 = vld [vmem:[#allocation10 + $0x80] sm:$0xff]  ;;  %v1347_v20 = vpack.c.bf16 %v447_v12, %v443_v11  ;;  %v161_v53 = vsub.s32 1, %v1997_v49 }
  0x80   :  { %1356 = vmatprep.subr.bf16.mxu1 %v1355_v56  ;;  %v446_v19 = vld [vmem:[#allocation10 + $0xa0] sm:$0xff]  ;;  %v1363_v21 = vpack.c.bf16 %v449_v14, %v445_v13  ;;  %v444_v22 = vld [vmem:[#allocation10 + $0x90] sm:$0xff]  ;;  %v451_v24 = vld [vmem:[#allocation10 + $0xc8] sm:$0xff] }
  0x81   :  { %1271 = vmatmul.mubr.msk.f32.vlgmr.msra.gmra.mrb[0].mxu0 %vm175_vm0, %v115_v2  ;;  %v448_v23 = vld [vmem:[#allocation10 + $0xb0] sm:$0xff]  ;;  %v455_v25 = vld [vmem:[#allocation10 + $0xe8] sm:$0xff]  ;;  %v453_v26 = vld [vmem:[#allocation10 + $0xd8] sm:$0xff]  ;;  %v1349_v29 = vpack.c.bf16 %v446_v19, %v442_v18 }
  0x82   :  { %1277 = vmatmul.mubr.msk.f32.vlgmr.msra.gmra.mrb[0].mxu1 %vm175_vm0, %v115_v2  ;;  %1342 = vmatpush1.bf16.msra.mxu0 %v1341_v3  ;;  %v457_v27 = vld [vmem:[#allocation10 + $0xf8] sm:$0xff]  ;;  %v117_v28 = vld [vmem:[#allocation4 + $0x10] sm:$0xff]  ;;  %v1365_v30 = vpack.c.bf16 %v448_v23, %v444_v22  ;;  %v450_v31 = vld [vmem:[#allocation10 + $0xc0] sm:$0xff]  ;;  %v1351_v32 = vpack.c.bf16 %v455_v25, %v451_v24 }
  0x83   :  { %1358 = vmatpush1.bf16.msra.mxu1 %v1357_v4  ;;  %264 = vmatprep.mubr.f32.mxu0 %v1800_v0  ;;  %v1367_v33 = vpack.c.bf16 %v457_v27, %v453_v26  ;;  %v454_v34 = vld [vmem:[#allocation10 + $0xe0] sm:$0xff]  ;;  %v452_v35 = vld [vmem:[#allocation10 + $0xd0] sm:$0xff]  ;;  %v118_v37 = vld [vmem:[#allocation4 + $0x18] sm:$0xff] }
  0x84   :  { %365 = vmatprep.mubr.f32.mxu1 %v1800_v0  ;;  %1344 = vmatprep.subr.bf16.mxu0 %v1343_v7  ;;  %v456_v36 = vld [vmem:[#allocation10 + $0xf0] sm:$0xff]  ;;  %v1353_v38 = vpack.c.bf16 %v454_v34, %v450_v31  ;;  %v119_v40 = vld [vmem:[#allocation4 + $0x20] sm:$0xff]  ;;  %v120_v41 = vld [vmem:[#allocation4 + $0x28] sm:$0xff] }
  0x85   :  { %1360 = vmatprep.subr.bf16.mxu1 %v1359_v8  ;;  %1272 = vmatmul.mubr.msk.f32.gmra.mrb[2].mxu0 %vm175_vm0, %v116_v15  ;;  %v1369_v39 = vpack.c.bf16 %v456_v36, %v452_v35  ;;  %v420_v42 = vld [vmem:[#allocation7] sm:$0xff]  ;;  %v421_v43 = vld [vmem:[#allocation7 + $0x8] sm:$0xff]  ;;  %v422_v44 = vld [vmem:[#allocation7 + $0x10] sm:$0xff] }
  0x86   :  { %1278 = vmatmul.mubr.msk.f32.gmra.mrb[2].mxu1 %vm175_vm0, %v116_v15  ;;  %270 = vmatprep.mubr.f32.mxu0 %v1800_v0  ;;  %v423_v45 = vld [vmem:[#allocation7 + $0x18] sm:$0xff]  ;;  %v424_v46 = vld [vmem:[#allocation7 + $0x20] sm:$0xff]  ;;  %v425_v47 = vld [vmem:[#allocation7 + $0x28] sm:$0xff] }
  0x87   :  { %371 = vmatprep.mubr.f32.mxu1 %v1800_v0  ;;  %1346 = vmatpush1.bf16.msra.mxu0 %v1345_v16  ;;  %v153_v52 = vld [vmem:[%s2171_s6] sm:$0xf] }
  0x88   :  { %1362 = vmatpush1.bf16.msra.mxu1 %v1361_v17  ;;  %1348 = vmatprep.subr.bf16.mxu0 %v1347_v20  ;;  %v2008_v54 = vrot.slane %v153_v52, %v157_v50  ;;  %v2012_v55 = vrot.slane %v153_v52, %v165_v51  ;;  %v2016_v56 = vrot.slane %v153_v52, %v161_v53  ;;  %v458_v36 = vld [vmem:[%s2172_s7] sm:$0xf]  ;;  %s2097_s7 = smov 0  }
  0x89   :  { %1364 = vmatprep.subr.bf16.mxu1 %v1363_v21  ;;  %1273 = vmatmul.mubr.msk.f32.gmra.mrb[4].mxu0 %vm175_vm0, %v117_v28 }
  0x8a   :  { %1279 = vmatmul.mubr.msk.f32.gmra.mrb[4].mxu1 %vm175_vm0, %v117_v28  ;;  %276 = vmatprep.mubr.f32.mxu0 %v1800_v0 }
  0x8b   :  { %377 = vmatprep.mubr.f32.mxu1 %v1800_v0  ;;  %1350 = vmatpush1.bf16.msra.mxu0 %v1349_v29 }
  0x8c   :  { %1366 = vmatpush1.bf16.msra.mxu1 %v1365_v30  ;;  %1352 = vmatprep.subr.bf16.mxu0 %v1351_v32 }
  0x8d   :  { %1368 = vmatprep.subr.bf16.mxu1 %v1367_v33  ;;  %1274 = vmatmul.mubr.msk.f32.gmra.mrb[6].mxu0 %vm175_vm0, %v118_v37 }
  0x8e   :  { %1280 = vmatmul.mubr.msk.f32.gmra.mrb[6].mxu1 %vm175_vm0, %v118_v37  ;;  %282 = vmatprep.mubr.f32.mxu0 %v1800_v0 }
  0x8f   :  { %383 = vmatprep.mubr.f32.mxu1 %v1800_v0  ;;  %1354 = vmatpush1.bf16.msra.mxu0 %v1353_v38 }
  0x90   :  { %1370 = vmatpush1.bf16.msra.mxu1 %v1369_v39 }
  0x91   :  { %1275 = vmatmul.mubr.msk.f32.gmra.mrb[8].mxu0 %vm175_vm0, %v119_v40 }
  0x92   :  { %1281 = vmatmul.mubr.msk.f32.gmra.mrb[8].mxu1 %vm175_vm0, %v119_v40  ;;  %288 = vmatprep.mubr.f32.mxu0 %v1800_v0 }
  0x93   :  { %389 = vmatprep.mubr.f32.mxu1 %v1800_v0 }
  0x95   :  { %1276 = vmatmul.mubr.msk.f32.gmra.mrb[10].mxu0 %vm175_vm0, %v120_v41 }
  0x96   :  { %1282 = vmatmul.mubr.msk.f32.gmra.mrb[10].mxu1 %vm175_vm0, %v120_v41  ;;  %562 = vmatprep.mubr.f32.mxu0 %v1800_v0 }
  0x97   :  { %663 = vmatprep.mubr.f32.mxu1 %v1800_v0 }
  0x99   :  { %1283 = vmatmul.mubr.msk.f32.vlgmr.msra.gmra.mrb[12].mxu0 %vm175_vm0, %v420_v42 }
  0x9a   :  { %1289 = vmatmul.mubr.msk.f32.vlgmr.msra.gmra.mrb[12].mxu1 %vm175_vm0, %v420_v42  ;;  %568 = vmatprep.mubr.f32.mxu0 %v1800_v0 }
  0x9b   :  { %669 = vmatprep.mubr.f32.mxu1 %v1800_v0 }
  0x9d   :  { %1284 = vmatmul.mubr.msk.f32.gmra.mrb[14].mxu0 %vm175_vm0, %v421_v43 }
  0x9e   :  { %1290 = vmatmul.mubr.msk.f32.gmra.mrb[14].mxu1 %vm175_vm0, %v421_v43  ;;  %574 = vmatprep.mubr.f32.mxu0 %v1800_v0  ;;  %v2049_v43 = vrot.slane %v458_v36, %v157_v50 }
  0x9f   :  { %675 = vmatprep.mubr.f32.mxu1 %v1800_v0 }
  0xa1   :  { %1285 = vmatmul.mubr.msk.f32.gmra.mrb[16].mxu0 %vm175_vm0, %v422_v44 }
  0xa2   :  { %1291 = vmatmul.mubr.msk.f32.gmra.mrb[16].mxu1 %vm175_vm0, %v422_v44  ;;  %580 = vmatprep.mubr.f32.mxu0 %v1800_v0  ;;  %v2053_v44 = vrot.slane %v458_v36, %v165_v51 }
  0xa3   :  { %681 = vmatprep.mubr.f32.mxu1 %v1800_v0 }
  0xa5   :  { %1286 = vmatmul.mubr.msk.f32.gmra.mrb[18].mxu0 %vm175_vm0, %v423_v45 }
  0xa6   :  { %1292 = vmatmul.mubr.msk.f32.gmra.mrb[18].mxu1 %vm175_vm0, %v423_v45  ;;  %586 = vmatprep.mubr.f32.mxu0 %v1800_v0 }
  0xa7   :  { %687 = vmatprep.mubr.f32.mxu1 %v1800_v0 }
  0xa9   :  { %1287 = vmatmul.mubr.msk.f32.gmra.mrb[20].mxu0 %vm175_vm0, %v424_v46 }
  0xaa   :  { %1293 = vmatmul.mubr.msk.f32.gmra.mrb[20].mxu1 %vm175_vm0, %v424_v46  ;;  %592 = vmatprep.mubr.f32.mxu0 %v1800_v0 }
  0xab   :  { %693 = vmatprep.mubr.f32.mxu1 %v1800_v0  ;;  %v169_v0 = vsub.s32 3, %v1997_v49 }
  0xad   :  { %1288 = vmatmul.mubr.msk.f32.gmra.mrb[22].mxu0 %vm175_vm0, %v425_v47  ;;  %v2020_v57 = vrot.slane %v153_v52, %v169_v0  ;;  %v2063_v48 = vrot.slane %v458_v36, %v169_v0 }
  0xae   :  { %1294 = vmatmul.mubr.msk.f32.gmra.mrb[22].mxu1 %vm175_vm0, %v425_v47  ;;  %v2059_v47 = vrot.slane %v458_v36, %v161_v53  ;;  %v2093_v36 = vmov 0.0  }
 0x154   :  { %v260_v58 = vpop.f32.mrb[0].mxu0 }
 0x155   :  { %v361_v59 = vpop.f32.mrb[0].mxu1  ;;  %v261_v60 = vadd.f32 %v260_v58, %v2008_v54  ;;  %v262_v62 = vpop.f32.mrb[1].mxu0 }
 0x156   :  { %v362_v61 = vadd.f32 %v361_v59, %v2012_v55  ;;  %v363_v63 = vpop.f32.mrb[1].mxu1  ;;  %v263_v2 = vadd.f32 %v262_v62, %v2016_v56 }
 0x157   :  { %v364_v3 = vadd.f32 %v363_v63, %v2020_v57  ;;  %396 = vst [vmem:[#allocation2] sm:$0xff] %v261_v60 }
 0x158   :  { %398 = vst [vmem:[#allocation2 + $0x10] sm:$0xff] %v362_v61  ;;  %397 = vst [vmem:[#allocation2 + $0x8] sm:$0xff] %v263_v2  ;;  %v266_v4 = vpop.f32.mrb[2].mxu0 }
 0x159   :  { %399 = vst [vmem:[#allocation2 + $0x18] sm:$0xff] %v364_v3  ;;  %v367_v5 = vpop.f32.mrb[2].mxu1  ;;  %v267_v6 = vadd.f32 %v266_v4, %v2008_v54  ;;  %v268_v8 = vpop.f32.mrb[3].mxu0 }
 0x15a   :  { %v368_v7 = vadd.f32 %v367_v5, %v2012_v55  ;;  %v369_v9 = vpop.f32.mrb[3].mxu1  ;;  %v269_v10 = vadd.f32 %v268_v8, %v2016_v56 }
 0x15b   :  { %v370_v11 = vadd.f32 %v369_v9, %v2020_v57  ;;  %400 = vst [vmem:[#allocation2 + $0x20] sm:$0xff] %v267_v6 }
 0x15c   :  { %402 = vst [vmem:[#allocation2 + $0x30] sm:$0xff] %v368_v7  ;;  %401 = vst [vmem:[#allocation2 + $0x28] sm:$0xff] %v269_v10  ;;  %v272_v12 = vpop.f32.mrb[4].mxu0 }
 0x15d   :  { %403 = vst [vmem:[#allocation2 + $0x38] sm:$0xff] %v370_v11  ;;  %v373_v13 = vpop.f32.mrb[4].mxu1  ;;  %v273_v14 = vadd.f32 %v272_v12, %v2008_v54  ;;  %v274_v16 = vpop.f32.mrb[5].mxu0 }
 0x15e   :  { %v374_v15 = vadd.f32 %v373_v13, %v2012_v55  ;;  %v375_v17 = vpop.f32.mrb[5].mxu1  ;;  %v275_v18 = vadd.f32 %v274_v16, %v2016_v56 }
 0x15f   :  { %v376_v19 = vadd.f32 %v375_v17, %v2020_v57  ;;  %404 = vst [vmem:[#allocation2 + $0x40] sm:$0xff] %v273_v14 }
 0x160   :  { %406 = vst [vmem:[#allocation2 + $0x50] sm:$0xff] %v374_v15  ;;  %405 = vst [vmem:[#allocation2 + $0x48] sm:$0xff] %v275_v18  ;;  %v278_v20 = vpop.f32.mrb[6].mxu0 }
 0x161   :  { %407 = vst [vmem:[#allocation2 + $0x58] sm:$0xff] %v376_v19  ;;  %v379_v21 = vpop.f32.mrb[6].mxu1  ;;  %v279_v22 = vadd.f32 %v278_v20, %v2008_v54  ;;  %v280_v24 = vpop.f32.mrb[7].mxu0 }
 0x162   :  { %v380_v23 = vadd.f32 %v379_v21, %v2012_v55  ;;  %v381_v25 = vpop.f32.mrb[7].mxu1  ;;  %v281_v26 = vadd.f32 %v280_v24, %v2016_v56 }
 0x163   :  { %v382_v27 = vadd.f32 %v381_v25, %v2020_v57  ;;  %408 = vst [vmem:[#allocation2 + $0x60] sm:$0xff] %v279_v22 }
 0x164   :  { %410 = vst [vmem:[#allocation2 + $0x70] sm:$0xff] %v380_v23  ;;  %409 = vst [vmem:[#allocation2 + $0x68] sm:$0xff] %v281_v26  ;;  %v284_v28 = vpop.f32.mrb[8].mxu0 }
 0x165   :  { %411 = vst [vmem:[#allocation2 + $0x78] sm:$0xff] %v382_v27  ;;  %v385_v29 = vpop.f32.mrb[8].mxu1  ;;  %v285_v30 = vadd.f32 %v284_v28, %v2008_v54  ;;  %v286_v32 = vpop.f32.mrb[9].mxu0 }
 0x166   :  { %v386_v31 = vadd.f32 %v385_v29, %v2012_v55  ;;  %v387_v33 = vpop.f32.mrb[9].mxu1  ;;  %v287_v34 = vadd.f32 %v286_v32, %v2016_v56 }
 0x167   :  { %v388_v35 = vadd.f32 %v387_v33, %v2020_v57  ;;  %412 = vst [vmem:[#allocation2 + $0x80] sm:$0xff] %v285_v30 }
 0x168   :  { %414 = vst [vmem:[#allocation2 + $0x90] sm:$0xff] %v386_v31  ;;  %413 = vst [vmem:[#allocation2 + $0x88] sm:$0xff] %v287_v34  ;;  %v290_v37 = vpop.f32.mrb[10].mxu0  ;;  %v2089_v34 = vmov 0.0  }
 0x169   :  { %415 = vst [vmem:[#allocation2 + $0x98] sm:$0xff] %v388_v35  ;;  %v391_v38 = vpop.f32.mrb[10].mxu1  ;;  %v291_v39 = vadd.f32 %v290_v37, %v2008_v54  ;;  %v292_v41 = vpop.f32.mrb[11].mxu0  ;;  %v2091_v35 = vmov 0.0   ;;  %v2095_v37 = vmov 0.0  }
 0x16a   :  { %v392_v40 = vadd.f32 %v391_v38, %v2012_v55  ;;  %v393_v42 = vpop.f32.mrb[11].mxu1  ;;  %v293_v45 = vadd.f32 %v292_v41, %v2016_v56 }
 0x16b   :  { %v394_v46 = vadd.f32 %v393_v42, %v2020_v57  ;;  %416 = vst [vmem:[#allocation2 + $0xa0] sm:$0xff] %v291_v39 }
 0x16c   :  { %418 = vst [vmem:[#allocation2 + $0xb0] sm:$0xff] %v392_v40  ;;  %417 = vst [vmem:[#allocation2 + $0xa8] sm:$0xff] %v293_v45  ;;  %v564_v50 = vpop.f32.mrb[12].mxu0 }
 0x16d   :  { %419 = vst [vmem:[#allocation2 + $0xb8] sm:$0xff] %v394_v46  ;;  %v665_v52 = vpop.f32.mrb[12].mxu1  ;;  %v565_v51 = vadd.f32 %v564_v50, %v2049_v43  ;;  %v566_v55 = vpop.f32.mrb[13].mxu0 }
 0x16e   :  { %v666_v54 = vadd.f32 %v665_v52, %v2053_v44  ;;  %v667_v56 = vpop.f32.mrb[13].mxu1  ;;  %v567_v57 = vadd.f32 %v566_v55, %v2059_v47 }
 0x16f   :  { %v668_v53 = vadd.f32 %v667_v56, %v2063_v48  ;;  %700 = vst [vmem:[#allocation3] sm:$0xff] %v565_v51 }
 0x170   :  { %702 = vst [vmem:[#allocation3 + $0x10] sm:$0xff] %v666_v54  ;;  %701 = vst [vmem:[#allocation3 + $0x8] sm:$0xff] %v567_v57  ;;  %v570_v49 = vpop.f32.mrb[14].mxu0 }
 0x171   :  { %703 = vst [vmem:[#allocation3 + $0x18] sm:$0xff] %v668_v53  ;;  %v671_v0 = vpop.f32.mrb[14].mxu1  ;;  %v571_v58 = vadd.f32 %v570_v49, %v2049_v43  ;;  %v572_v60 = vpop.f32.mrb[15].mxu0 }
 0x172   :  { %v672_v59 = vadd.f32 %v671_v0, %v2053_v44  ;;  %v673_v61 = vpop.f32.mrb[15].mxu1  ;;  %v573_v62 = vadd.f32 %v572_v60, %v2059_v47 }
 0x173   :  { %v674_v63 = vadd.f32 %v673_v61, %v2063_v48  ;;  %704 = vst [vmem:[#allocation3 + $0x20] sm:$0xff] %v571_v58 }
 0x174   :  { %706 = vst [vmem:[#allocation3 + $0x30] sm:$0xff] %v672_v59  ;;  %705 = vst [vmem:[#allocation3 + $0x28] sm:$0xff] %v573_v62  ;;  %v576_v2 = vpop.f32.mrb[16].mxu0 }
 0x175   :  { %707 = vst [vmem:[#allocation3 + $0x38] sm:$0xff] %v674_v63  ;;  %v677_v3 = vpop.f32.mrb[16].mxu1  ;;  %v577_v4 = vadd.f32 %v576_v2, %v2049_v43  ;;  %v578_v6 = vpop.f32.mrb[17].mxu0 }
 0x176   :  { %v678_v5 = vadd.f32 %v677_v3, %v2053_v44  ;;  %v679_v7 = vpop.f32.mrb[17].mxu1  ;;  %v579_v8 = vadd.f32 %v578_v6, %v2059_v47 }
 0x177   :  { %v680_v9 = vadd.f32 %v679_v7, %v2063_v48  ;;  %708 = vst [vmem:[#allocation3 + $0x40] sm:$0xff] %v577_v4 }
 0x178   :  { %710 = vst [vmem:[#allocation3 + $0x50] sm:$0xff] %v678_v5  ;;  %709 = vst [vmem:[#allocation3 + $0x48] sm:$0xff] %v579_v8  ;;  %v582_v10 = vpop.f32.mrb[18].mxu0 }
 0x179   :  { %711 = vst [vmem:[#allocation3 + $0x58] sm:$0xff] %v680_v9  ;;  %v683_v11 = vpop.f32.mrb[18].mxu1  ;;  %v583_v12 = vadd.f32 %v582_v10, %v2049_v43  ;;  %v584_v14 = vpop.f32.mrb[19].mxu0 }
 0x17a   :  { %v684_v13 = vadd.f32 %v683_v11, %v2053_v44  ;;  %v685_v15 = vpop.f32.mrb[19].mxu1  ;;  %v585_v16 = vadd.f32 %v584_v14, %v2059_v47 }
 0x17b   :  { %v686_v17 = vadd.f32 %v685_v15, %v2063_v48  ;;  %712 = vst [vmem:[#allocation3 + $0x60] sm:$0xff] %v583_v12 }
 0x17c   :  { %714 = vst [vmem:[#allocation3 + $0x70] sm:$0xff] %v684_v13  ;;  %713 = vst [vmem:[#allocation3 + $0x68] sm:$0xff] %v585_v16  ;;  %v588_v18 = vpop.f32.mrb[20].mxu0 }
 0x17d   :  { %715 = vst [vmem:[#allocation3 + $0x78] sm:$0xff] %v686_v17  ;;  %v689_v19 = vpop.f32.mrb[20].mxu1  ;;  %v589_v20 = vadd.f32 %v588_v18, %v2049_v43  ;;  %v590_v22 = vpop.f32.mrb[21].mxu0 }
 0x17e   :  { %v690_v21 = vadd.f32 %v689_v19, %v2053_v44  ;;  %v691_v23 = vpop.f32.mrb[21].mxu1  ;;  %v591_v24 = vadd.f32 %v590_v22, %v2059_v47 }
 0x17f   :  { %v692_v25 = vadd.f32 %v691_v23, %v2063_v48  ;;  %716 = vst [vmem:[#allocation3 + $0x80] sm:$0xff] %v589_v20 }
 0x180   :  { %718 = vst [vmem:[#allocation3 + $0x90] sm:$0xff] %v690_v21  ;;  %717 = vst [vmem:[#allocation3 + $0x88] sm:$0xff] %v591_v24  ;;  %v594_v26 = vpop.f32.mrb[22].mxu0 }
 0x181   :  { %719 = vst [vmem:[#allocation3 + $0x98] sm:$0xff] %v692_v25  ;;  %v695_v27 = vpop.f32.mrb[22].mxu1  ;;  %v595_v28 = vadd.f32 %v594_v26, %v2049_v43  ;;  %v596_v30 = vpop.f32.mrb[23].mxu0 }
 0x182   :  { %v696_v29 = vadd.f32 %v695_v27, %v2053_v44  ;;  %v697_v31 = vpop.f32.mrb[23].mxu1  ;;  %v597_v32 = vadd.f32 %v596_v30, %v2059_v47 }
 0x183   :  { %v698_v33 = vadd.f32 %v697_v31, %v2063_v48  ;;  %720 = vst [vmem:[#allocation3 + $0xa0] sm:$0xff] %v595_v28 }
 0x184   :  { %722 = vst [vmem:[#allocation3 + $0xb0] sm:$0xff] %v696_v29  ;;  %721 = vst [vmem:[#allocation3 + $0xa8] sm:$0xff] %v597_v32 }
 0x185   :  { %723 = vst [vmem:[#allocation3 + $0xb8] sm:$0xff] %v698_v33 }
 0x186 LB: > { %v752_v38 = vld [vmem:[#allocation12 + $0x8] sm:$0xff]  ;;  %v751_v40 = vld [vmem:[#allocation12] sm:$0xff]  ;;  %v1801_v45 = vmov 0.0   ;;  %v1802_v51 = vmov 0   ;;  %v1219_v54 = vstv %s1788_s7  ;;  %v754_v59 = vld [vmem:[#allocation12 + $0x18] sm:$0xff]  ;;  %s1295_s14 = sshll.u32 %s1788_s7, 3  ;;  %s1788_s7 = sphi %s2097_s7, %s730_s7   ;;  %v1784_v37 = vphi %v2095_v37, %v2176_v37   ;;  %v1780_v36 = vphi %v2093_v36, %v1227_v36   ;;  %v1776_v35 = vphi %v2091_v35, %v2175_v35   ;;  %v1772_v34 = vphi %v2089_v34, %v1229_v34  }
 0x187   : > { %v756_v39 = vld [vmem:[#allocation12 + $0x28] sm:$0xff]  ;;  %v755_v42 = vld [vmem:[#allocation12 + $0x20] sm:$0xff]  ;;  %879 = vmatprep.mubr.f32.mxu0 %v1801_v45  ;;  %950 = vmatprep.mubr.f32.mxu1 %v1801_v45  ;;  %vm1220_vm1 = vcmp.lt.s32.totalorder %v1219_v54, %v1949_v1  ;;  %v758_v60 = vld [vmem:[#allocation12 + $0x38] sm:$0xff]  ;;  %s2125_s26 = sshra.s32 %s1295_s14, 3  ;;  %s730_s7 = sadd.s32 1, %s1788_s7  }
 0x188   : > { %v1371_v41 = vpack.c.bf16 %v756_v39, %v752_v38  ;;  %v760_v43 = vld [vmem:[#allocation12 + $0x48] sm:$0xff]  ;;  %v1373_v46 = vpack.c.bf16 %v755_v42, %v751_v40  ;;  %v759_v48 = vld [vmem:[#allocation12 + $0x40] sm:$0xff]  ;;  %1553 = vset.pattern.permute.xlu0 %v1802_v51  ;;  %v1221_v49 = vsel %vm1220_vm1, 1, %v1802_v51  ;;  %v1403_v62 = vpack.c.bf16 %v758_v60, %v754_v59  ;;  %v753_v63 = vld [vmem:[#allocation12 + $0x10] sm:$0xff]  ;;  %s1305_s22 = sshll.u32 %s2125_s26, 5  ;;  %p727_p6 = scmp.ge.s32.totalorder %s730_s7, 6  }
 0x189   : > { %v764_v44 = vld [vmem:[#allocation12 + $0x68] sm:$0xff]  ;;  %v763_v50 = vld [vmem:[#allocation12 + $0x60] sm:$0xff]  ;;  %1223 = vperm.xlu0 %1553, %v1221_v49   ;;  %v757_v2 = vld [vmem:[#allocation12 + $0x30] sm:$0xff]  ;;  %s740_s23 = scalar_lea.vmem [#allocation2], %s1305_s22  ;;  %s746_s25 = scalar_lea.vmem [#allocation3], %s1305_s22 }
 0x18a   : > { %v1375_v47 = vpack.c.bf16 %v764_v44, %v760_v43  ;;  %v768_v52 = vld [vmem:[#allocation12 + $0x88] sm:$0xff]  ;;  %1372 = vmatprep.subr.bf16.mxu0 %v1371_v41  ;;  %v1377_v56 = vpack.c.bf16 %v763_v50, %v759_v48  ;;  %v767_v57 = vld [vmem:[#allocation12 + $0x80] sm:$0xff]  ;;  %v1405_v3 = vpack.c.bf16 %v757_v2, %v753_v63  ;;  %1404 = vmatprep.subr.bf16.mxu1 %v1403_v62  ;;  %v762_v5 = vld [vmem:[#allocation12 + $0x58] sm:$0xff]  ;;  %s1803_s27 = smov (%p727_p6), [#allocation15]  }
 0x18b   : > { %v772_v55 = vld [vmem:[#allocation12 + $0xa8] sm:$0xff]  ;;  %1374 = vmatpush1.bf16.msra.mxu0 %v1373_v46  ;;  %v771_v53 = vld [vmem:[#allocation12 + $0xa0] sm:$0xff]  ;;  %v766_v6 = vld [vmem:[#allocation12 + $0x78] sm:$0xff]  ;;  %s1238_s28 = sshll.u32 (%p727_p6), %s1803_s27, 4  ;;  %s1239_s28 = int_to_ptr.vmem [resolvable:$true] %s1238_s28 }
 0x18c   : > { %1376 = vmatprep.subr.bf16.mxu0 %v1375_v47  ;;  %v1379_v0 = vpack.c.bf16 %v772_v55, %v768_v52  ;;  %v776_v58 = vld [vmem:[#allocation12 + $0xc8] sm:$0xff]  ;;  %v1381_v4 = vpack.c.bf16 %v771_v53, %v767_v57  ;;  %v761_v7 = vld [vmem:[#allocation12 + $0x50] sm:$0xff]  ;;  %v775_v9 = vld [vmem:[#allocation12 + $0xc0] sm:$0xff]  ;;  %1406 = vmatpush1.bf16.msra.mxu1 %v1405_v3  ;;  %v1407_v11 = vpack.c.bf16 %v766_v6, %v762_v5  ;;  %s1718_s3 = scalar_lea.vmem (%p727_p6), %s1239_s28, 256  ;;  %p1723_p8 = scmp.lt.s32.totalorder (%p727_p6), %s1239_s28, %s1239_s28 }
 0x18d   : > { %v780_v61 = vld [vmem:[#allocation12 + $0xe8] sm:$0xff]  ;;  %v779_v10 = vld [vmem:[#allocation12 + $0xe0] sm:$0xff]  ;;  %v765_v12 = vld [vmem:[#allocation12 + $0x70] sm:$0xff]  ;;  %p1719_p7 = scmp.ne.s32.totalorder (%p727_p6), %s1239_s28, %s1718_s3  ;;  %p1724_p9 = scmp.lt.s32.totalorder (%p727_p6), %s1718_s3, %s1718_s3 }
 0x18e   : > { %v1383_v8 = vpack.c.bf16 %v780_v61, %v776_v58  ;;  %v784_v13 = vld [vmem:[#allocation12 + $0x108] sm:$0xff]  ;;  %v1409_v15 = vpack.c.bf16 %v765_v12, %v761_v7  ;;  %v770_v16 = vld [vmem:[#allocation12 + $0x98] sm:$0xff]  ;;  %1408 = vmatprep.subr.bf16.mxu1 %v1407_v11  ;;  %v769_v18 = vld [vmem:[#allocation12 + $0x90] sm:$0xff]  ;;  %v1385_v20 = vpack.c.bf16 %v779_v10, %v775_v9 }
 0x18f   : > { %1378 = vmatpush1.bf16.msra.mxu0 %v1377_v56  ;;  %v788_v14 = vld [vmem:[#allocation12 + $0x128] sm:$0xff]  ;;  %v774_v17 = vld [vmem:[#allocation12 + $0xb8] sm:$0xff]  ;;  %v773_v19 = vld [vmem:[#allocation12 + $0xb0] sm:$0xff]  ;;  %p1725_p10 = por (%p727_p6), %p1724_p9, %p1723_p8 }
 0x190   : > { %1380 = vmatprep.subr.bf16.mxu0 %v1379_v0  ;;  %v783_v21 = vld [vmem:[#allocation12 + $0x100] sm:$0xff]  ;;  %v1411_v23 = vpack.c.bf16 %v774_v17, %v770_v16  ;;  %v1387_v24 = vpack.c.bf16 %v788_v14, %v784_v13  ;;  %1410 = vmatpush1.bf16.msra.mxu1 %v1409_v15  ;;  %v792_v25 = vld [vmem:[#allocation12 + $0x148] sm:$0xff]  ;;  %v1413_v26 = vpack.c.bf16 %v773_v19, %v769_v18  ;;  %v778_v27 = vld [vmem:[#allocation12 + $0xd8] sm:$0xff] }
 0x191   : > { %v787_v22 = vld [vmem:[#allocation12 + $0x120] sm:$0xff]  ;;  %v782_v28 = vld [vmem:[#allocation12 + $0xf8] sm:$0xff]  ;;  %v796_v29 = vld [vmem:[#allocation12 + $0x168] sm:$0xff]  ;;  %p1726_p11 = pnand (%p727_p6), %p1725_p10, %p1719_p7 }
 0x192   : > { %1412 = vmatprep.subr.bf16.mxu1 %v1411_v23  ;;  %v1415_v30 = vpack.c.bf16 %v782_v28, %v778_v27  ;;  %v777_v31 = vld [vmem:[#allocation12 + $0xd0] sm:$0xff]  ;;  %v1389_v33 = vpack.c.bf16 %v787_v22, %v783_v21  ;;  %v786_v38 = vld [vmem:[#allocation12 + $0x118] sm:$0xff]  ;;  %v1391_v40 = vpack.c.bf16 %v796_v29, %v792_v25  ;;  %v791_v41 = vld [vmem:[#allocation12 + $0x140] sm:$0xff] }
 0x193   : > { %1382 = vmatpush1.bf16.msra.mxu0 %v1381_v4  ;;  %v781_v32 = vld [vmem:[#allocation12 + $0xf0] sm:$0xff]  ;;  %v790_v39 = vld [vmem:[#allocation12 + $0x138] sm:$0xff]  ;;  %v795_v42 = vld [vmem:[#allocation12 + $0x160] sm:$0xff] }
 0x194   : > { %1384 = vmatprep.subr.bf16.mxu0 %v1383_v8  ;;  %1414 = vmatpush1.bf16.msra.mxu1 %v1413_v26  ;;  %v800_v43 = vld [vmem:[#allocation12 + $0x188] sm:$0xff]  ;;  %v1417_v44 = vpack.c.bf16 %v781_v32, %v777_v31  ;;  %v1419_v47 = vpack.c.bf16 %v790_v39, %v786_v38  ;;  %v785_v48 = vld [vmem:[#allocation12 + $0x110] sm:$0xff]  ;;  %v794_v52 = vld [vmem:[#allocation12 + $0x158] sm:$0xff]  ;;  %v1393_v54 = vpack.c.bf16 %v795_v42, %v791_v41 }
 0x195   : > { %v804_v46 = vld [vmem:[#allocation12 + $0x1a8] sm:$0xff]  ;;  %1416 = vmatprep.subr.bf16.mxu1 %v1415_v30  ;;  %v789_v50 = vld [vmem:[#allocation12 + $0x130] sm:$0xff]  ;;  %v798_v51 = vld [vmem:[#allocation12 + $0x178] sm:$0xff] }
 0x196   : > { %v1395_v55 = vpack.c.bf16 %v804_v46, %v800_v43  ;;  %v799_v56 = vld [vmem:[#allocation12 + $0x180] sm:$0xff]  ;;  %v808_v53 = vld [vmem:[#allocation12 + $0x1c8] sm:$0xff]  ;;  %v1421_v49 = vpack.c.bf16 %v789_v50, %v785_v48  ;;  %v1423_v58 = vpack.c.bf16 %v798_v51, %v794_v52  ;;  %v793_v59 = vld [vmem:[#allocation12 + $0x150] sm:$0xff] }
 0x197   : > { %1386 = vmatpush1.bf16.msra.mxu0 %v1385_v20  ;;  %v803_v57 = vld [vmem:[#allocation12 + $0x1a0] sm:$0xff]  ;;  %v812_v0 = vld [vmem:[#allocation12 + $0x1e8] sm:$0xff]  ;;  %v797_v60 = vld [vmem:[#allocation12 + $0x170] sm:$0xff] }
 0x198   : > { %1388 = vmatprep.subr.bf16.mxu0 %v1387_v24  ;;  %1418 = vmatpush1.bf16.msra.mxu1 %v1417_v44  ;;  %v802_v61 = vld [vmem:[#allocation12 + $0x198] sm:$0xff]  ;;  %v1397_v63 = vpack.c.bf16 %v803_v57, %v799_v56  ;;  %v1399_v2 = vpack.c.bf16 %v812_v0, %v808_v53  ;;  %v807_v3 = vld [vmem:[#allocation12 + $0x1c0] sm:$0xff]  ;;  %v962_v5 = vld [vmem:[#allocation13 + $0x8] sm:$0xff]  ;;  %v1425_v6 = vpack.c.bf16 %v797_v60, %v793_v59 }
 0x199   : > { %1420 = vmatprep.subr.bf16.mxu1 %v1419_v47  ;;  %v806_v62 = vld [vmem:[#allocation12 + $0x1b8] sm:$0xff]  ;;  %v811_v4 = vld [vmem:[#allocation12 + $0x1e0] sm:$0xff]  ;;  %v966_v7 = vld [vmem:[#allocation13 + $0x28] sm:$0xff] }
 0x19a   : > { %v1427_v8 = vpack.c.bf16 %v806_v62, %v802_v61  ;;  %v801_v9 = vld [vmem:[#allocation12 + $0x190] sm:$0xff]  ;;  %v810_v11 = vld [vmem:[#allocation12 + $0x1d8] sm:$0xff]  ;;  %v1401_v13 = vpack.c.bf16 %v811_v4, %v807_v3  ;;  %v1435_v14 = vpack.c.bf16 %v966_v7, %v962_v5  ;;  %v961_v15 = vld [vmem:[#allocation13] sm:$0xff] }
 0x19b   : > { %1390 = vmatpush1.bf16.msra.mxu0 %v1389_v33  ;;  %v805_v10 = vld [vmem:[#allocation12 + $0x1b0] sm:$0xff]  ;;  %v814_v12 = vld [vmem:[#allocation12 + $0x1f8] sm:$0xff]  ;;  %v965_v16 = vld [vmem:[#allocation13 + $0x20] sm:$0xff] }
 0x19c   : > { %1392 = vmatprep.subr.bf16.mxu0 %v1391_v40  ;;  %1422 = vmatpush1.bf16.msra.mxu1 %v1421_v49  ;;  %v970_v17 = vld [vmem:[#allocation13 + $0x48] sm:$0xff]  ;;  %v1429_v18 = vpack.c.bf16 %v805_v10, %v801_v9  ;;  %v1431_v20 = vpack.c.bf16 %v814_v12, %v810_v11  ;;  %v809_v21 = vld [vmem:[#allocation12 + $0x1d0] sm:$0xff]  ;;  %v964_v23 = vld [vmem:[#allocation13 + $0x18] sm:$0xff]  ;;  %v1437_v25 = vpack.c.bf16 %v965_v16, %v961_v15 }
 0x19d   : > { %1424 = vmatprep.subr.bf16.mxu1 %v1423_v58  ;;  %v974_v19 = vld [vmem:[#allocation13 + $0x68] sm:$0xff]  ;;  %v813_v22 = vld [vmem:[#allocation12 + $0x1f0] sm:$0xff]  ;;  %v968_v24 = vld [vmem:[#allocation13 + $0x38] sm:$0xff] }
 0x19e   : > { %v1439_v26 = vpack.c.bf16 %v974_v19, %v970_v17  ;;  %v969_v27 = vld [vmem:[#allocation13 + $0x40] sm:$0xff]  ;;  %v978_v29 = vld [vmem:[#allocation13 + $0x88] sm:$0xff]  ;;  %v1433_v30 = vpack.c.bf16 %v813_v22, %v809_v21  ;;  %v1467_v32 = vpack.c.bf16 %v968_v24, %v964_v23  ;;  %v963_v33 = vld [vmem:[#allocation13 + $0x10] sm:$0xff] }
 0x19f   : > { %1394 = vmatpush1.bf16.msra.mxu0 %v1393_v54  ;;  %v973_v28 = vld [vmem:[#allocation13 + $0x60] sm:$0xff]  ;;  %v982_v31 = vld [vmem:[#allocation13 + $0xa8] sm:$0xff]  ;;  %v967_v38 = vld [vmem:[#allocation13 + $0x30] sm:$0xff] }
 0x1a0   : > { %1396 = vmatprep.subr.bf16.mxu0 %v1395_v55  ;;  %1426 = vmatpush1.bf16.msra.mxu1 %v1425_v6  ;;  %v972_v39 = vld [vmem:[#allocation13 + $0x58] sm:$0xff]  ;;  %v1441_v41 = vpack.c.bf16 %v973_v28, %v969_v27  ;;  %v1443_v42 = vpack.c.bf16 %v982_v31, %v978_v29  ;;  %v977_v43 = vld [vmem:[#allocation13 + $0x80] sm:$0xff]  ;;  %v986_v46 = vld [vmem:[#allocation13 + $0xc8] sm:$0xff]  ;;  %v1469_v47 = vpack.c.bf16 %v967_v38, %v963_v33 }
 0x1a1   : > { %1428 = vmatprep.subr.bf16.mxu1 %v1427_v8  ;;  %v976_v40 = vld [vmem:[#allocation13 + $0x78] sm:$0xff]  ;;  %v981_v44 = vld [vmem:[#allocation13 + $0xa0] sm:$0xff]  ;;  %v990_v48 = vld [vmem:[#allocation13 + $0xe8] sm:$0xff] }
 0x1a2   : > { %v1471_v50 = vpack.c.bf16 %v976_v40, %v972_v39  ;;  %v971_v52 = vld [vmem:[#allocation13 + $0x50] sm:$0xff]  ;;  %v980_v54 = vld [vmem:[#allocation13 + $0x98] sm:$0xff]  ;;  %v1445_v56 = vpack.c.bf16 %v981_v44, %v977_v43  ;;  %v1447_v57 = vpack.c.bf16 %v990_v48, %v986_v46  ;;  %v985_v53 = vld [vmem:[#allocation13 + $0xc0] sm:$0xff] }
 0x1a3   : > { %1398 = vmatpush1.bf16.msra.mxu0 %v1397_v63  ;;  %v975_v51 = vld [vmem:[#allocation13 + $0x70] sm:$0xff]  ;;  %v984_v55 = vld [vmem:[#allocation13 + $0xb8] sm:$0xff]  ;;  %v989_v49 = vld [vmem:[#allocation13 + $0xe0] sm:$0xff] }
 0x1a4   : > { %1400 = vmatprep.subr.bf16.mxu0 %v1399_v2  ;;  %1430 = vmatpush1.bf16.msra.mxu1 %v1429_v18  ;;  %v994_v0 = vld [vmem:[#allocation13 + $0x108] sm:$0xff]  ;;  %v1473_v58 = vpack.c.bf16 %v975_v51, %v971_v52  ;;  %v1475_v60 = vpack.c.bf16 %v984_v55, %v980_v54  ;;  %v979_v61 = vld [vmem:[#allocation13 + $0x90] sm:$0xff]  ;;  %v988_v63 = vld [vmem:[#allocation13 + $0xd8] sm:$0xff]  ;;  %v1449_v3 = vpack.c.bf16 %v989_v49, %v985_v53 }
 0x1a5   : > { %1432 = vmatprep.subr.bf16.mxu1 %v1431_v20  ;;  %v998_v59 = vld [vmem:[#allocation13 + $0x128] sm:$0xff]  ;;  %v983_v62 = vld [vmem:[#allocation13 + $0xb0] sm:$0xff]  ;;  %v992_v2 = vld [vmem:[#allocation13 + $0xf8] sm:$0xff] }
 0x1a6   : > { %v1451_v4 = vpack.c.bf16 %v998_v59, %v994_v0  ;;  %v993_v5 = vld [vmem:[#allocation13 + $0x100] sm:$0xff]  ;;  %v1002_v7 = vld [vmem:[#allocation13 + $0x148] sm:$0xff]  ;;  %v1477_v8 = vpack.c.bf16 %v983_v62, %v979_v61  ;;  %v1479_v10 = vpack.c.bf16 %v992_v2, %v988_v63  ;;  %v987_v11 = vld [vmem:[#allocation13 + $0xd0] sm:$0xff] }
 0x1a7   : > { %1402 = vmatpush1.bf16.msra.mxu0 %v1401_v13  ;;  %v997_v6 = vld [vmem:[#allocation13 + $0x120] sm:$0xff]  ;;  %v1006_v9 = vld [vmem:[#allocation13 + $0x168] sm:$0xff]  ;;  %v991_v12 = vld [vmem:[#allocation13 + $0xf0] sm:$0xff] }
 0x1a8   : > { %1436 = vmatprep.subr.bf16.mxu0 %v1435_v14  ;;  %1434 = vmatpush1.bf16.msra.mxu1 %v1433_v30  ;;  %v996_v13 = vld [vmem:[#allocation13 + $0x118] sm:$0xff]  ;;  %v1455_v15 = vpack.c.bf16 %v1006_v9, %v1002_v7  ;;  %v1001_v16 = vld [vmem:[#allocation13 + $0x140] sm:$0xff]  ;;  %v1010_v18 = vld [vmem:[#allocation13 + $0x188] sm:$0xff]  ;;  %v1481_v19 = vpack.c.bf16 %v991_v12, %v987_v11 }
 0x1a9   : > { %1468 = vmatprep.subr.bf16.mxu1 %v1467_v32  ;;  %v1000_v14 = vld [vmem:[#allocation13 + $0x138] sm:$0xff]  ;;  %v1005_v17 = vld [vmem:[#allocation13 + $0x160] sm:$0xff]  ;;  %v1014_v20 = vld [vmem:[#allocation13 + $0x1a8] sm:$0xff] }
 0x1aa   : > { %880 = vmatmul.mubr.f32.vlgmr.msra.gmra.mrb[0].mxu0 %v1784_v37  ;;  %v1483_v21 = vpack.c.bf16 %v1000_v14, %v996_v13  ;;  %v995_v22 = vld [vmem:[#allocation13 + $0x110] sm:$0xff]  ;;  %v1004_v24 = vld [vmem:[#allocation13 + $0x158] sm:$0xff]  ;;  %v1459_v27 = vpack.c.bf16 %v1014_v20, %v1010_v18  ;;  %v1009_v28 = vld [vmem:[#allocation13 + $0x180] sm:$0xff] }
 0x1ab   : > { %1438 = vmatpush1.bf16.msra.mxu0 %v1437_v25  ;;  %1089 = vmatprep.mubr.f32.mxu0 %v1801_v45  ;;  %v999_v23 = vld [vmem:[#allocation13 + $0x130] sm:$0xff]  ;;  %v1008_v25 = vld [vmem:[#allocation13 + $0x178] sm:$0xff]  ;;  %v1013_v29 = vld [vmem:[#allocation13 + $0x1a0] sm:$0xff] }
 0x1ac   : > { %1440 = vmatprep.subr.bf16.mxu0 %v1439_v26  ;;  %951 = vmatmul.mubr.f32.vlgmr.msra.gmra.mrb[0].mxu1 %v1784_v37  ;;  %v1457_v26 = vpack.c.bf16 %v1005_v17, %v1001_v16  ;;  %v1018_v30 = vld [vmem:[#allocation13 + $0x1c8] sm:$0xff]  ;;  %v1485_v31 = vpack.c.bf16 %v999_v23, %v995_v22  ;;  %v1487_v33 = vpack.c.bf16 %v1008_v25, %v1004_v24  ;;  %v1003_v38 = vld [vmem:[#allocation13 + $0x150] sm:$0xff]  ;;  %v1012_v40 = vld [vmem:[#allocation13 + $0x198] sm:$0xff] }
 0x1ad   : > { %1470 = vmatpush1.bf16.msra.mxu1 %v1469_v47  ;;  %1160 = vmatprep.mubr.f32.mxu1 %v1801_v45  ;;  %v1453_v45 = vpack.c.bf16 %v997_v6, %v993_v5  ;;  %v1022_v32 = vld [vmem:[#allocation13 + $0x1e8] sm:$0xff]  ;;  %v1007_v39 = vld [vmem:[#allocation13 + $0x170] sm:$0xff]  ;;  %v1017_v44 = vld [vmem:[#allocation13 + $0x1c0] sm:$0xff] }
 0x1ae   : > { %1472 = vmatprep.subr.bf16.mxu1 %v1471_v50  ;;  %v1463_v43 = vpack.c.bf16 %v1022_v32, %v1018_v30  ;;  %v1021_v46 = vld [vmem:[#allocation13 + $0x1e0] sm:$0xff]  ;;  %v1489_v47 = vpack.c.bf16 %v1007_v39, %v1003_v38  ;;  %v1011_v50 = vld [vmem:[#allocation13 + $0x190] sm:$0xff]  ;;  %v1020_v51 = vld [vmem:[#allocation13 + $0x1d8] sm:$0xff] }
 0x1af   : > { %1442 = vmatpush1.bf16.msra.mxu0 %v1441_v41  ;;  %v1016_v41 = vld [vmem:[#allocation13 + $0x1b8] sm:$0xff]  ;;  %v1015_v52 = vld [vmem:[#allocation13 + $0x1b0] sm:$0xff]  ;;  %v1465_v55 = vpack.c.bf16 %v1021_v46, %v1017_v44  ;;  %v742_v59 = vld [vmem:[%s740_s23 + $0x8] sm:$0xff] }
 0x1b0   : > { %1444 = vmatprep.subr.bf16.mxu0 %v1443_v42  ;;  %v1461_v42 = vpack.c.bf16 %v1013_v29, %v1009_v28  ;;  %v1491_v48 = vpack.c.bf16 %v1016_v41, %v1012_v40  ;;  %v1024_v54 = vld [vmem:[#allocation13 + $0x1f8] sm:$0xff]  ;;  %v1019_v53 = vld [vmem:[#allocation13 + $0x1d0] sm:$0xff]  ;;  %v747_v22 = vld [vmem:[%s746_s25] sm:$0xff] }
 0x1b1   : > { %1474 = vmatpush1.bf16.msra.mxu1 %v1473_v58  ;;  %v1023_v49 = vld [vmem:[#allocation13 + $0x1f0] sm:$0xff]  ;;  %v741_v58 = vld [vmem:[%s740_s23] sm:$0xff]  ;;  %v744_v5 = vld [vmem:[%s740_s23 + $0x18] sm:$0xff] }
 0x1b2   : > { %1476 = vmatprep.subr.bf16.mxu1 %v1475_v60  ;;  %v1497_v0 = vpack.c.bf16 %v1023_v49, %v1019_v53  ;;  %v748_v23 = vld [vmem:[%s746_s25 + $0x8] sm:$0xff]  ;;  %v749_v30 = vld [vmem:[%s746_s25 + $0x10] sm:$0xff]  ;;  %v750_v32 = vld [vmem:[%s746_s25 + $0x18] sm:$0xff] }
 0x1b3   : > { %1446 = vmatpush1.bf16.msra.mxu0 %v1445_v56  ;;  %v1493_v56 = vpack.c.bf16 %v1015_v52, %v1011_v50 }
 0x1b4   : > { %1448 = vmatprep.subr.bf16.mxu0 %v1447_v57  ;;  %v1495_v57 = vpack.c.bf16 %v1024_v54, %v1020_v51 }
 0x1b5   : > { %1478 = vmatpush1.bf16.msra.mxu1 %v1477_v8 }
 0x1b6   : > { %1480 = vmatprep.subr.bf16.mxu1 %v1479_v10 }
 0x1b7   : > { %1450 = vmatpush1.bf16.msra.mxu0 %v1449_v3  ;;  %v743_v3 = vld [vmem:[%s740_s23 + $0x10] sm:$0xff] }
 0x1b8   : > { %1452 = vmatprep.subr.bf16.mxu0 %v1451_v4 }
 0x1b9   : > { %1482 = vmatpush1.bf16.msra.mxu1 %v1481_v19 }
 0x1ba   : > { %1484 = vmatprep.subr.bf16.mxu1 %v1483_v21 }
 0x1bb   : > { %1454 = vmatpush1.bf16.msra.mxu0 %v1453_v45 }
 0x1bc   : > { %1456 = vmatprep.subr.bf16.mxu0 %v1455_v15 }
 0x1bd   : > { %1486 = vmatpush1.bf16.msra.mxu1 %v1485_v31 }
 0x1be   : > { %1488 = vmatprep.subr.bf16.mxu1 %v1487_v33 }
 0x1bf   : > { %1458 = vmatpush1.bf16.msra.mxu0 %v1457_v26 }
 0x1c0   : > { %1460 = vmatprep.subr.bf16.mxu0 %v1459_v27 }
 0x1c1   : > { %1490 = vmatpush1.bf16.msra.mxu1 %v1489_v47 }
 0x1c2   : > { %1492 = vmatprep.subr.bf16.mxu1 %v1491_v48 }
 0x1c3   : > { %1462 = vmatpush1.bf16.msra.mxu0 %v1461_v42 }
 0x1c4   : > { %1464 = vmatprep.subr.bf16.mxu0 %v1463_v43 }
 0x1c5   : > { %1494 = vmatpush1.bf16.msra.mxu1 %v1493_v56 }
 0x1c6   : > { %1496 = vmatprep.subr.bf16.mxu1 %v1495_v57 }
 0x1c7   : > { %1466 = vmatpush1.bf16.msra.mxu0 %v1465_v55 }
 0x1c9   : > { %1498 = vmatpush1.bf16.msra.mxu1 %v1497_v0 }
 0x1ca   : > { %1090 = vmatmul.mubr.f32.vlgmr.msra.gmra.mrb[2].mxu0 %v1776_v35 }
 0x1cc   : > { %1161 = vmatmul.mubr.f32.vlgmr.msra.gmra.mrb[2].mxu1 %v1776_v35 }
 0x208   : > { %v1224_v18 = vpop.permute.xlu0 %1223 }
 0x209   : > { %vm1225_vm2 = vcmp.eq.s32.totalorder %v1224_v18, 1 }
 0x27d   : > { %v881_v60 = vpop.f32.mrb[0].mxu0 }
 0x27e   : > { %v957_v61 = vadd.f32 %v881_v60, %v741_v58  ;;  %v883_v62 = vpop.f32.mrb[1].mxu0 }
 0x27f   : > { %v958_v63 = vadd.f32 %v883_v62, %v742_v59  ;;  %v952_v6 = vpop.f32.mrb[0].mxu1 }
 0x280   : > { %v1299_v2 = vmul.f32 -1.442695, %v957_v61  ;;  %v959_v7 = vadd.f32 %v952_v6, %v743_v3  ;;  %v954_v8 = vpop.f32.mrb[1].mxu1 }
 0x281   : > { %v1300_v4 = vmul.f32 -1.442695, %v958_v63  ;;  %v960_v9 = vadd.f32 %v954_v8, %v744_v5 }
 0x282   : > { %1554 = vpow2.f32 %v1299_v2  ;;  %v1301_v10 = vmul.f32 -1.442695, %v959_v7 }
 0x283   : > { %1556 = vpow2.f32 %v1300_v4 }
 0x284   : > { %1558 = vpow2.f32 %v1301_v10 }
 0x285   : > { %1560 = vtanh.f32 %v960_v9 }
 0x28c   : > { %v1555_v11 = vpop.eup %1554 }
 0x28d   : > { %v1557_v12 = vpop.eup %1556  ;;  %v1180_v13 = vadd.f32 1.0, %v1555_v11 }
 0x28e   : > { %v1181_v14 = vadd.f32 1.0, %v1557_v12  ;;  %v1559_v45 = vpop.eup %1558 }
 0x28f   : > { %1562 = vrcp.f32 %v1180_v13  ;;  %v1561_v15 = vpop.eup %1560  ;;  %v1182_v17 = vadd.f32 1.0, %v1559_v45 }
 0x290   : > { %1564 = vrcp.f32 %v1181_v14 }
 0x291   : > { %1566 = vrcp.f32 %v1182_v17 }
 0x299   : > { %v1563_v16 = vpop.eup %1562 }
 0x29a   : > { %v1565_v19 = vpop.eup %1564  ;;  %v1191_v20 = vmul.f32 %v1563_v16, %v1561_v15 }
 0x29b   : > { %v1190_v21 = vmul.f32 %v1780_v36, %v1565_v19  ;;  %v1567_v41 = vpop.eup %1566 }
 0x29d   : > { %v1192_v24 = vadd.f32 %v1191_v20, %v1190_v21  ;;  %v1091_v25 = vpop.f32.mrb[2].mxu0 }
 0x29e   : > { %v1167_v26 = vadd.f32 %v1091_v25, %v747_v22  ;;  %v1093_v27 = vpop.f32.mrb[3].mxu0 }
 0x29f   : > { %1568 = vtanh.f32 %v1192_v24  ;;  %v1227_v36 = vsel %vm1225_vm2, %v1192_v24, %v1780_v36   ;;  %v1168_v28 = vadd.f32 %v1093_v27, %v748_v23  ;;  %v1162_v33 = vpop.f32.mrb[2].mxu1 }
 0x2a0   : > { %v1302_v29 = vmul.f32 -1.442695, %v1167_v26  ;;  %v1169_v38 = vadd.f32 %v1162_v33, %v749_v30  ;;  %v1164_v39 = vpop.f32.mrb[3].mxu1 }
 0x2a1   : > { %v1303_v31 = vmul.f32 -1.442695, %v1168_v28  ;;  %v1170_v40 = vadd.f32 %v1164_v39, %v750_v32 }
 0x2a2   : > { %1570 = vpow2.f32 %v1302_v29  ;;  %v1304_v42 = vmul.f32 -1.442695, %v1169_v38 }
 0x2a3   : > { %1572 = vpow2.f32 %v1303_v31 }
 0x2a4   : > { %1574 = vpow2.f32 %v1304_v42 }
 0x2a5   : > { %1576 = vtanh.f32 %v1170_v40 }
 0x2a9   : > { %v1569_v43 = vpop.eup %1568 }
 0x2aa   : > { %v1194_v44 = vmul.f32 %v1569_v43, %v1567_v41 }
 0x2ac   : > { %v1571_v46 = vpop.eup %1570  ;;  %v1226_v47 = vsel %vm1225_vm2, %v1194_v44, %v1784_v37  }
 0x2ad   : > { %v1573_v48 = vpop.eup %1572  ;;  %v1204_v50 = vadd.f32 1.0, %v1571_v46  ;;  %1230 = vst [vmem:[#allocation15] sm:$0xff] (%p727_p6), %v1226_v47 }
 0x2ae   : > { %v1205_v52 = vadd.f32 1.0, %v1573_v48  ;;  %v1575_v51 = vpop.eup %1574 }
 0x2af   : > { %1578 = vrcp.f32 %v1204_v50  ;;  %v1577_v54 = vpop.eup %1576  ;;  %v1206_v56 = vadd.f32 1.0, %v1575_v51 }
 0x2b0   : > { %1580 = vrcp.f32 %v1205_v52 }
 0x2b1   : > { %1582 = vrcp.f32 %v1206_v56 }
 0x2b9   : > { %v1579_v55 = vpop.eup %1578 }
 0x2ba   : > { %v1581_v57 = vpop.eup %1580  ;;  %v1215_v53 = vmul.f32 %v1579_v55, %v1577_v54 }
 0x2bb   : > { %v1214_v49 = vmul.f32 %v1772_v34, %v1581_v57  ;;  %v1583_v37 = vpop.eup %1582 }
 0x2bd   : > { %v1216_v0 = vadd.f32 %v1215_v53, %v1214_v49 }
 0x2bf   : > { %1584 = vtanh.f32 %v1216_v0  ;;  %v1229_v34 = vsel %vm1225_vm2, %v1216_v0, %v1772_v34  }
 0x2c7   :  { %729 = sbr.rel (!%p727_p6) target bundleno = 390 (0x186), region = 89 }
 0x2c9   : > { %v1585_v58 = vpop.eup %1584 }
 0x2ca   : > { %v1218_v59 = vmul.f32 %v1585_v58, %v1583_v37  ;;  %v2176_v37 = vmov %v1226_v47 }
 0x2cc   : > { %v1228_v60 = vsel %vm1225_vm2, %v1218_v59, %v1776_v35  }
 0x2cd   : > { %v2175_v35 = vmov %v1228_v60  ;;  %1231 = vst [vmem:[#allocation15 + $0x8] sm:$0xff] (%p727_p6), %v1228_v60 }
 0x2ce   :  { %1729 = shalt.err (!%p1726_p11)
}
 0x2cf   :  { %s1730_s29 = scalar_lea.hbm %s2174_s9, 256 }
 0x2d0   :  { %p1731_p12 = scmp.ne.s32.totalorder %s2174_s9, %s1730_s29  ;;  %p1734_p13 = scmp.lt.u32.totalorder %s1730_s29, %s2174_s9 }
 0x2d2   :  { %p1736_p0 = pnand %p1734_p13, %p1731_p12 }
 0x2d4   :  { %1739 = shalt.err (!%p1736_p0)
}
 0x2d5   :  { %1241 = dma.vmem_to_hbm [thread:$0]  %s1239_s28, 256, %s2174_s9, [#allocation6]  }
 0x2d6   :  { %1768 = dma.done.wait [#allocation6], 256  }
 0x2d7   :  { %1769 = vsyncadd [#allocation6], 4294967040 }
 0x2d8   :  { %1245 = vsyncpa [#allocation5], 1 }
 0x2d9   :  { %1246 = vsyncpa [#allocation8], 1 }
 0x2da   :  { %1247 = vsyncpa [#allocation11], 1 }
 0x2db   :  { %1248 = vsyncpa [#allocation14], 1 }
 0x2dc   :  { %1249 = vsyncpa [#allocation6], 1 }

</bundles_post_ra>
